<compile_context>
chip_gen: v7x
topology: tpu7x:2x2x1
jax: 0.10.0
libtpu: 0.0.40
codegen_flags: <defaults>
</compile_context>

<pallas_src>
import numpy as np
import jax
import jax.numpy as jnp
from jax.experimental import pallas as pl
from jax.experimental.pallas import tpu as pltpu


# ---------------------------------------------------------------------------
# Static geometry fixed by the module (seq_len 20 -> conv length 18).
_L_IN = 20          # input sequence length
_L_CONV = 18        # conv output length
_K = 3              # conv taps
_B_STRIDE = 24      # per-batch row stride in the joint (batch*length) layout
_SLAB_LANES = 128   # lane width of the packed parameter slab


def _round8(n):
    return ((n + 7) // 8) * 8


# name -> (rows, cols) of each pre-transformed parameter inside the slab.
_PARAM_SPECS = (
    ("w1f",   _K * 4,        32),   # conv1d weight, im2col layout (k*Cin, Cout)
    ("b1",    1,             32),
    ("w2af",  _K * 32,       64),   # conv2d
    ("b2a",   1,             64),
    ("w2bf",  _K * 64,       64),   # con2d_1
    ("b2b",   1,             64),
    ("w2cf",  _K * 64,       64),   # con2d_2
    ("b2c",   1,             64),
    ("wlinf", _L_CONV * 64,  32),   # linear_1, flattened rows = l*64 + c
    ("blin",  1,             32),
    ("wih0s", 32,            96),   # LSTM W_ih layer 0, forget-gate cols dropped
    ("wih1s", 32,            96),   # LSTM W_ih layer 1, forget-gate cols dropped
    ("wd0",   32,             4),   # dense rows acting on h_n layer 0
    ("wd1",   32,             4),   # dense rows acting on h_n layer 1
    ("bd",    1,              4),
)


def _build_layout():
    layout, off = {}, 0
    for name, rows, cols in _PARAM_SPECS:
        layout[name] = (off, rows, cols)
        off += _round8(rows)        # 8-row aligned blocks -> aligned slab slices
    return layout, off


_LAYOUT, _SLAB_ROWS = _build_layout()     # 1824 rows x 128 lanes (~0.9 MiB)


def pack_params(params):
    """Pre-transform and pack all parameters into one (rows, 128) f32 slab."""
    (w1, b1, w2a, b2a, w2b, b2b, w2c, b2c,
     wlin, blin, wih0, wih1, wdense, bdense) = params
    entries = {
        "w1f":   w1.reshape(_K * 4, 32),
        "b1":    b1.reshape(1, 32),
        "w2af":  w2a.reshape(_K * 32, 64),
        "b2a":   b2a.reshape(1, 64),
        "w2bf":  w2b.reshape(_K * 64, 64),
        "b2b":   b2b.reshape(1, 64),
        "w2cf":  w2c.reshape(_K * 64, 64),
        "b2c":   b2c.reshape(1, 64),
        "wlinf": wlin.reshape(_L_CONV * 64, 32),
        "blin":  blin.reshape(1, 32),
        # forget gate only scales c0 == 0 -> drop its 32 columns (keep i, g, o)
        "wih0s": jnp.concatenate([wih0[:, 0:32], wih0[:, 64:128]], axis=1),
        "wih1s": jnp.concatenate([wih1[:, 0:32], wih1[:, 64:128]], axis=1),
        "wd0":   wdense[0:32, :],
        "wd1":   wdense[32:64, :],
        "bd":    bdense.reshape(1, 4),
    }
    slab = jnp.zeros((_SLAB_ROWS, _SLAB_LANES), jnp.float32)
    for name, (off, rows, cols) in _LAYOUT.items():
        slab = slab.at[off:off + rows, :cols].set(entries[name].astype(jnp.float32))
    return slab


# ---------------------------------------------------------------------------
# Kernel
def model_kernel(x_ref, p_ref, out_ref, pad_ref):
    B = out_ref.shape[0]
    M = B * _B_STRIDE                 # joint rows (incl. per-batch slack rows)
    n_slack = _B_STRIDE - _L_CONV     # trailing pad + garbage rows per batch

    def P(name):
        off, rows, cols = _LAYOUT[name]
        return p_ref[off:off + rows, :cols]

    def conv_relu(lhs, wname, bname):
        return jnp.maximum(
            jnp.dot(lhs, P(wname), preferred_element_type=jnp.float32) + P(bname),
            0.0)

    zeros_slack = jnp.zeros((n_slack, pad_ref.shape[1]), jnp.float32)

    def write_padded(y):
        # y: (M, C) joint conv output; row b*stride + i is valid for i < 18.
        # Store shifted by one row (leading zero pad of the next conv) and
        # re-zero each batch block's trailing pad / slack rows.
        pad_ref[1:M + 1, :y.shape[1]] = y
        for b in range(B):
            start = b * _B_STRIDE + _L_CONV + 1
            pad_ref[start:start + n_slack, :] = zeros_slack

    # persistent padded activation scratch; per-batch pad rows stay zero
    pad_ref[...] = jnp.zeros_like(pad_ref)

    # conv1d(4->32, k=3, valid) + ReLU : one im2col matmul, batch folded into M
    lhs = jnp.concatenate([x_ref[k:k + M, :] for k in range(_K)], axis=1)
    write_padded(conv_relu(lhs, "w1f", "b1"))

    # conv2d / con2d_1 / con2d_2 (k=(3,1), pad=(1,0)) + ReLU : length-axis convs
    for wname, bname, cin in (("w2af", "b2a", 32),
                              ("w2bf", "b2b", 64),
                              ("w2cf", "b2c", 64)):
        lhs = jnp.concatenate([pad_ref[k:k + M, :cin] for k in range(_K)], axis=1)
        write_padded(conv_relu(lhs, wname, bname))

    # flatten + linear_1 + ReLU : single (B, 1152) x (1152, 32) matmul
    rows = []
    for b in range(B):
        base = b * _B_STRIDE + 1
        blk = pad_ref[base:base + _L_CONV, :]                       # (18, 64)
        rows.append(jnp.concatenate(
            [blk[l:l + 1, :] for l in range(_L_CONV)], axis=1))     # (1, 1152)
    lin_lhs = jnp.concatenate(rows, axis=0)                          # (B, 1152)
    hl = jnp.maximum(
        jnp.dot(lin_lhs, P("wlinf"), preferred_element_type=jnp.float32)
        + P("blin"), 0.0)                                            # (B, 32)

    # 2-layer LSTM, single time step, h0 = c0 = 0, zero biases (init_weights);
    # W_hh terms vanish and the forget gate was dropped host-side.
    def lstm_step(inp, wname):
        g = jnp.dot(inp, P(wname), preferred_element_type=jnp.float32)  # (B, 96)
        i = jax.nn.sigmoid(g[:, 0:32])
        c = i * jnp.tanh(g[:, 32:64])
        o = jax.nn.sigmoid(g[:, 64:96])
        return o * jnp.tanh(c)

    h0 = lstm_step(hl, "wih0s")          # h_n layer 0
    h1 = lstm_step(h0, "wih1s")          # h_n layer 1

    # dense over concat(h_n) without a lane concat; single output store
    out_ref[...] = (jnp.dot(h0, P("wd0"), preferred_element_type=jnp.float32)
                    + jnp.dot(h1, P("wd1"), preferred_element_type=jnp.float32)
                    + P("bd"))


@jax.jit
def run_model(x, params):
    B, L, C = x.shape
    assert L == _L_IN and C == 4
    n_rows = _round8(B * _B_STRIDE + _K - 1)      # joint rows + tap read slack
    slab = pack_params(params)
    # Lay x out as joint rows b*stride + t (channels-last); slack rows are zero.
    x_rows = jnp.pad(
        jnp.pad(x.astype(jnp.float32),
                ((0, 0), (0, _B_STRIDE - L), (0, 0))).reshape(B * _B_STRIDE, C),
        ((0, n_rows - B * _B_STRIDE), (0, 0)))
    return pl.pallas_call(
        model_kernel,
        out_shape=jax.ShapeDtypeStruct((B, 4), jnp.float32),
        in_specs=[pl.BlockSpec(memory_space=pltpu.MemorySpace.VMEM),
                  pl.BlockSpec(memory_space=pltpu.MemorySpace.VMEM)],
        out_specs=pl.BlockSpec(memory_space=pltpu.MemorySpace.VMEM),
        scratch_shapes=[pltpu.VMEM((n_rows, 64), jnp.float32)],
    )(x_rows, slab)


# ---------------------------------------------------------------------------
# Pure-JAX reference (same math, original parameter shapes) for verification.
def reference(x, params):
    (w1, b1, w2a, b2a, w2b, b2b, w2c, b2c,
     wlin, blin, wih0, wih1, wdense, bdense) = params

    def conv(y, w, bias):
        Lout = y.shape[1] - 2
        acc = jnp.zeros((y.shape[0], Lout, w.shape[2]), jnp.float32)
        for k in range(3):
            acc = acc + jnp.einsum('blc,cd->bld', y[:, k:k + Lout, :], w[k])
        return jax.nn.relu(acc + bias.reshape(1, 1, -1))

    y = conv(x, w1, b1)
    for (w, bias) in ((w2a, b2a), (w2b, b2b), (w2c, b2c)):
        y = conv(jnp.pad(y, ((0, 0), (1, 1), (0, 0))), w, bias)
    hl = jax.nn.relu(jnp.einsum('blc,lcd->bd', y, wlin) + blin)

    def lstm_step(inp, wih):
        g = inp @ wih
        i = jax.nn.sigmoid(g[:, 0:32])
        gg = jnp.tanh(g[:, 64:96])
        o = jax.nn.sigmoid(g[:, 96:128])
        return o * jnp.tanh(i * gg)

    h0 = lstm_step(hl, wih0)
    h1 = lstm_step(h0, wih1)
    feat = jnp.concatenate([h0, h1], axis=1)
    return feat @ wdense + bdense


def make_params(key):
    ks = jax.random.split(key, 16)
    s = 0.1
    w1 = jax.random.normal(ks[0], (3, 4, 32), jnp.float32) * s
    b1 = jax.random.normal(ks[1], (1, 32), jnp.float32) * s
    w2a = jax.random.normal(ks[2], (3, 32, 64), jnp.float32) * s
    b2a = jax.random.normal(ks[3], (1, 64), jnp.float32) * s
    w2b = jax.random.normal(ks[4], (3, 64, 64), jnp.float32) * s
    b2b = jax.random.normal(ks[5], (1, 64), jnp.float32) * s
    w2c = jax.random.normal(ks[6], (3, 64, 64), jnp.float32) * s
    b2c = jax.random.normal(ks[7], (1, 64), jnp.float32) * s
    wlin = jax.random.normal(ks[8], (18, 64, 32), jnp.float32) * s   # Linear(1152->32)
    blin = jax.random.normal(ks[9], (1, 32), jnp.float32) * s
    wih0 = jax.random.normal(ks[10], (32, 128), jnp.float32) * s     # LSTM W_ih layer 0 (transposed)
    wih1 = jax.random.normal(ks[11], (32, 128), jnp.float32) * s     # LSTM W_ih layer 1 (transposed)
    wdense = jax.random.normal(ks[12], (64, 4), jnp.float32) * s
    bdense = jax.random.normal(ks[13], (1, 4), jnp.float32) * s
    return (w1, b1, w2a, b2a, w2b, b2b, w2c, b2c,
            wlin, blin, wih0, wih1, wdense, bdense)


if __name__ == "__main__":
    key = jax.random.PRNGKey(0)
    kx, kp = jax.random.split(key)
    B, L, C = 2, 20, 4          # seq_len must be 20 so the conv output length is 18
    x = jax.random.normal(kx, (B, L, C), jnp.float32)
    params = make_params(kp)

    out = jax.block_until_ready(run_model(x, params))
    ref = jax.block_until_ready(reference(x, params))

    np.testing.assert_allclose(np.asarray(out), np.asarray(ref), rtol=1e-4, atol=1e-4)
    assert out.shape == (B, 4)
    print("KERNEL_OK")
</pallas_src>

<mosaic_0001>
module attributes {stable_mosaic.version = 11 : i64} {
  func.func @model_kernel(%arg0: memref<56x4xf32, #tpu.memory_space<vmem>>, %arg1: memref<1824x128xf32, #tpu.memory_space<vmem>>, %arg2: memref<2x4xf32, #tpu.memory_space<vmem>>, %arg3: memref<56x64xf32, #tpu.memory_space<vmem>>) attributes {dimension_semantics = [], scalar_prefetch = 0 : i64, scratch_operands = 1 : i64, tpu.core_type = #tpu.core_type<tc>} {
    %cst = arith.constant 0.000000e+00 : f32
    %0 = vector.broadcast %cst : f32 to vector<6x64xf32>
    %cst_0 = arith.constant 0.000000e+00 : f32
    %1 = vector.broadcast %cst_0 : f32 to vector<56x64xf32>
    %c0 = arith.constant 0 : index
    %c0_1 = arith.constant 0 : index
    %2 = vector.load %arg3[%c0, %c0_1] : memref<56x64xf32, #tpu.memory_space<vmem>>, vector<56x64xf32>
    tpu.vector_store %arg3[%c0, %c0_1], %1 {strides = array<i32>} : memref<56x64xf32, #tpu.memory_space<vmem>>, vector<56x64xf32>,
    %c0_2 = arith.constant 0 : index
    %c0_3 = arith.constant 0 : index
    %3 = vector.load %arg0[%c0_2, %c0_3] : memref<56x4xf32, #tpu.memory_space<vmem>>, vector<48x4xf32>
    %c1 = arith.constant 1 : index
    %c0_4 = arith.constant 0 : index
    %4 = vector.load %arg0[%c1, %c0_4] : memref<56x4xf32, #tpu.memory_space<vmem>>, vector<48x4xf32>
    %c2 = arith.constant 2 : index
    %c0_5 = arith.constant 0 : index
    %5 = vector.load %arg0[%c2, %c0_5] : memref<56x4xf32, #tpu.memory_space<vmem>>, vector<48x4xf32>
    %6 = tpu.concatenate %3, %4, %5 in 1 : vector<48x4xf32>, vector<48x4xf32>, vector<48x4xf32> -> vector<48x12xf32>
    %c0_6 = arith.constant 0 : index
    %c0_7 = arith.constant 0 : index
    %7 = vector.load %arg1[%c0_6, %c0_7] : memref<1824x128xf32, #tpu.memory_space<vmem>>, vector<12x32xf32>
    %cst_8 = arith.constant dense<0.000000e+00> : vector<48x32xf32>
    %8 = tpu.matmul %6, %7, %cst_8 {dimension_numbers = #tpu.dot_dimension_numbers<[1], [0], [0], [1], [0, 0, 1, 1], [], []>} : vector<48x12xf32>, vector<12x32xf32>, vector<48x32xf32> -> vector<48x32xf32>
    %c16 = arith.constant 16 : index
    %c0_9 = arith.constant 0 : index
    %9 = vector.load %arg1[%c16, %c0_9] : memref<1824x128xf32, #tpu.memory_space<vmem>>, vector<1x32xf32>
    %10 = vector.broadcast %9 : vector<1x32xf32> to vector<48x32xf32>
    %11 = arith.addf %8, %10 : vector<48x32xf32>
    %cst_10 = arith.constant 0.000000e+00 : f32
    %12 = vector.broadcast %cst_10 : f32 to vector<48x32xf32>
    %13 = arith.maximumf %11, %12 : vector<48x32xf32>
    %c1_11 = arith.constant 1 : index
    %c0_12 = arith.constant 0 : index
    %14 = vector.load %arg3[%c1_11, %c0_12] : memref<56x64xf32, #tpu.memory_space<vmem>>, vector<48x32xf32>
    tpu.vector_store %arg3[%c1_11, %c0_12], %13 {strides = array<i32>} : memref<56x64xf32, #tpu.memory_space<vmem>>, vector<48x32xf32>,
    %c19 = arith.constant 19 : index
    %c0_13 = arith.constant 0 : index
    %15 = vector.load %arg3[%c19, %c0_13] : memref<56x64xf32, #tpu.memory_space<vmem>>, vector<6x64xf32>
    tpu.vector_store %arg3[%c19, %c0_13], %0 {strides = array<i32>} : memref<56x64xf32, #tpu.memory_space<vmem>>, vector<6x64xf32>,
    %c43 = arith.constant 43 : index
    %c0_14 = arith.constant 0 : index
    %16 = vector.load %arg3[%c43, %c0_14] : memref<56x64xf32, #tpu.memory_space<vmem>>, vector<6x64xf32>
    tpu.vector_store %arg3[%c43, %c0_14], %0 {strides = array<i32>} : memref<56x64xf32, #tpu.memory_space<vmem>>, vector<6x64xf32>,
    %c0_15 = arith.constant 0 : index
    %c0_16 = arith.constant 0 : index
    %17 = vector.load %arg3[%c0_15, %c0_16] : memref<56x64xf32, #tpu.memory_space<vmem>>, vector<48x32xf32>
    %c1_17 = arith.constant 1 : index
    %c0_18 = arith.constant 0 : index
    %18 = vector.load %arg3[%c1_17, %c0_18] : memref<56x64xf32, #tpu.memory_space<vmem>>, vector<48x32xf32>
    %c2_19 = arith.constant 2 : index
    %c0_20 = arith.constant 0 : index
    %19 = vector.load %arg3[%c2_19, %c0_20] : memref<56x64xf32, #tpu.memory_space<vmem>>, vector<48x32xf32>
    %20 = tpu.concatenate %17, %18, %19 in 1 : vector<48x32xf32>, vector<48x32xf32>, vector<48x32xf32> -> vector<48x96xf32>
    %c24 = arith.constant 24 : index
    %c0_21 = arith.constant 0 : index
    %21 = vector.load %arg1[%c24, %c0_21] : memref<1824x128xf32, #tpu.memory_space<vmem>>, vector<96x64xf32>
    %cst_22 = arith.constant dense<0.000000e+00> : vector<48x64xf32>
    %22 = tpu.matmul %20, %21, %cst_22 {dimension_numbers = #tpu.dot_dimension_numbers<[1], [0], [0], [1], [0, 0, 1, 1], [], []>} : vector<48x96xf32>, vector<96x64xf32>, vector<48x64xf32> -> vector<48x64xf32>
    %c120 = arith.constant 120 : index
    %c0_23 = arith.constant 0 : index
    %23 = vector.load %arg1[%c120, %c0_23] : memref<1824x128xf32, #tpu.memory_space<vmem>>, vector<1x64xf32>
    %24 = vector.broadcast %23 : vector<1x64xf32> to vector<48x64xf32>
    %25 = arith.addf %22, %24 : vector<48x64xf32>
    %cst_24 = arith.constant 0.000000e+00 : f32
    %26 = vector.broadcast %cst_24 : f32 to vector<48x64xf32>
    %27 = arith.maximumf %25, %26 : vector<48x64xf32>
    %c1_25 = arith.constant 1 : index
    %c0_26 = arith.constant 0 : index
    %28 = vector.load %arg3[%c1_25, %c0_26] : memref<56x64xf32, #tpu.memory_space<vmem>>, vector<48x64xf32>
    tpu.vector_store %arg3[%c1_25, %c0_26], %27 {strides = array<i32>} : memref<56x64xf32, #tpu.memory_space<vmem>>, vector<48x64xf32>,
    %c19_27 = arith.constant 19 : index
    %c0_28 = arith.constant 0 : index
    %29 = vector.load %arg3[%c19_27, %c0_28] : memref<56x64xf32, #tpu.memory_space<vmem>>, vector<6x64xf32>
    tpu.vector_store %arg3[%c19_27, %c0_28], %0 {strides = array<i32>} : memref<56x64xf32, #tpu.memory_space<vmem>>, vector<6x64xf32>,
    %c43_29 = arith.constant 43 : index
    %c0_30 = arith.constant 0 : index
    %30 = vector.load %arg3[%c43_29, %c0_30] : memref<56x64xf32, #tpu.memory_space<vmem>>, vector<6x64xf32>
    tpu.vector_store %arg3[%c43_29, %c0_30], %0 {strides = array<i32>} : memref<56x64xf32, #tpu.memory_space<vmem>>, vector<6x64xf32>,
    %c0_31 = arith.constant 0 : index
    %c0_32 = arith.constant 0 : index
    %31 = vector.load %arg3[%c0_31, %c0_32] : memref<56x64xf32, #tpu.memory_space<vmem>>, vector<48x64xf32>
    %c1_33 = arith.constant 1 : index
    %c0_34 = arith.constant 0 : index
    %32 = vector.load %arg3[%c1_33, %c0_34] : memref<56x64xf32, #tpu.memory_space<vmem>>, vector<48x64xf32>
    %c2_35 = arith.constant 2 : index
    %c0_36 = arith.constant 0 : index
    %33 = vector.load %arg3[%c2_35, %c0_36] : memref<56x64xf32, #tpu.memory_space<vmem>>, vector<48x64xf32>
    %34 = tpu.concatenate %31, %32, %33 in 1 : vector<48x64xf32>, vector<48x64xf32>, vector<48x64xf32> -> vector<48x192xf32>
    %c128 = arith.constant 128 : index
    %c0_37 = arith.constant 0 : index
    %35 = vector.load %arg1[%c128, %c0_37] : memref<1824x128xf32, #tpu.memory_space<vmem>>, vector<192x64xf32>
    %cst_38 = arith.constant dense<0.000000e+00> : vector<48x64xf32>
    %36 = tpu.matmul %34, %35, %cst_38 {dimension_numbers = #tpu.dot_dimension_numbers<[1], [0], [0], [1], [0, 0, 1, 1], [], []>} : vector<48x192xf32>, vector<192x64xf32>, vector<48x64xf32> -> vector<48x64xf32>
    %c320 = arith.constant 320 : index
    %c0_39 = arith.constant 0 : index
    %37 = vector.load %arg1[%c320, %c0_39] : memref<1824x128xf32, #tpu.memory_space<vmem>>, vector<1x64xf32>
    %38 = vector.broadcast %37 : vector<1x64xf32> to vector<48x64xf32>
    %39 = arith.addf %36, %38 : vector<48x64xf32>
    %cst_40 = arith.constant 0.000000e+00 : f32
    %40 = vector.broadcast %cst_40 : f32 to vector<48x64xf32>
    %41 = arith.maximumf %39, %40 : vector<48x64xf32>
    %c1_41 = arith.constant 1 : index
    %c0_42 = arith.constant 0 : index
    %42 = vector.load %arg3[%c1_41, %c0_42] : memref<56x64xf32, #tpu.memory_space<vmem>>, vector<48x64xf32>
    tpu.vector_store %arg3[%c1_41, %c0_42], %41 {strides = array<i32>} : memref<56x64xf32, #tpu.memory_space<vmem>>, vector<48x64xf32>,
    %c19_43 = arith.constant 19 : index
    %c0_44 = arith.constant 0 : index
    %43 = vector.load %arg3[%c19_43, %c0_44] : memref<56x64xf32, #tpu.memory_space<vmem>>, vector<6x64xf32>
    tpu.vector_store %arg3[%c19_43, %c0_44], %0 {strides = array<i32>} : memref<56x64xf32, #tpu.memory_space<vmem>>, vector<6x64xf32>,
    %c43_45 = arith.constant 43 : index
    %c0_46 = arith.constant 0 : index
    %44 = vector.load %arg3[%c43_45, %c0_46] : memref<56x64xf32, #tpu.memory_space<vmem>>, vector<6x64xf32>
    tpu.vector_store %arg3[%c43_45, %c0_46], %0 {strides = array<i32>} : memref<56x64xf32, #tpu.memory_space<vmem>>, vector<6x64xf32>,
    %c0_47 = arith.constant 0 : index
    %c0_48 = arith.constant 0 : index
    %45 = vector.load %arg3[%c0_47, %c0_48] : memref<56x64xf32, #tpu.memory_space<vmem>>, vector<48x64xf32>
    %c1_49 = arith.constant 1 : index
    %c0_50 = arith.constant 0 : index
    %46 = vector.load %arg3[%c1_49, %c0_50] : memref<56x64xf32, #tpu.memory_space<vmem>>, vector<48x64xf32>
    %c2_51 = arith.constant 2 : index
    %c0_52 = arith.constant 0 : index
    %47 = vector.load %arg3[%c2_51, %c0_52] : memref<56x64xf32, #tpu.memory_space<vmem>>, vector<48x64xf32>
    %48 = tpu.concatenate %45, %46, %47 in 1 : vector<48x64xf32>, vector<48x64xf32>, vector<48x64xf32> -> vector<48x192xf32>
    %c328 = arith.constant 328 : index
    %c0_53 = arith.constant 0 : index
    %49 = vector.load %arg1[%c328, %c0_53] : memref<1824x128xf32, #tpu.memory_space<vmem>>, vector<192x64xf32>
    %cst_54 = arith.constant dense<0.000000e+00> : vector<48x64xf32>
    %50 = tpu.matmul %48, %49, %cst_54 {dimension_numbers = #tpu.dot_dimension_numbers<[1], [0], [0], [1], [0, 0, 1, 1], [], []>} : vector<48x192xf32>, vector<192x64xf32>, vector<48x64xf32> -> vector<48x64xf32>
    %c520 = arith.constant 520 : index
    %c0_55 = arith.constant 0 : index
    %51 = vector.load %arg1[%c520, %c0_55] : memref<1824x128xf32, #tpu.memory_space<vmem>>, vector<1x64xf32>
    %52 = vector.broadcast %51 : vector<1x64xf32> to vector<48x64xf32>
    %53 = arith.addf %50, %52 : vector<48x64xf32>
    %cst_56 = arith.constant 0.000000e+00 : f32
    %54 = vector.broadcast %cst_56 : f32 to vector<48x64xf32>
    %55 = arith.maximumf %53, %54 : vector<48x64xf32>
    %c1_57 = arith.constant 1 : index
    %c0_58 = arith.constant 0 : index
    %56 = vector.load %arg3[%c1_57, %c0_58] : memref<56x64xf32, #tpu.memory_space<vmem>>, vector<48x64xf32>
    tpu.vector_store %arg3[%c1_57, %c0_58], %55 {strides = array<i32>} : memref<56x64xf32, #tpu.memory_space<vmem>>, vector<48x64xf32>,
    %c19_59 = arith.constant 19 : index
    %c0_60 = arith.constant 0 : index
    %57 = vector.load %arg3[%c19_59, %c0_60] : memref<56x64xf32, #tpu.memory_space<vmem>>, vector<6x64xf32>
    tpu.vector_store %arg3[%c19_59, %c0_60], %0 {strides = array<i32>} : memref<56x64xf32, #tpu.memory_space<vmem>>, vector<6x64xf32>,
    %c43_61 = arith.constant 43 : index
    %c0_62 = arith.constant 0 : index
    %58 = vector.load %arg3[%c43_61, %c0_62] : memref<56x64xf32, #tpu.memory_space<vmem>>, vector<6x64xf32>
    tpu.vector_store %arg3[%c43_61, %c0_62], %0 {strides = array<i32>} : memref<56x64xf32, #tpu.memory_space<vmem>>, vector<6x64xf32>,
    %c1_63 = arith.constant 1 : index
    %c0_64 = arith.constant 0 : index
    %59 = vector.load %arg3[%c1_63, %c0_64] : memref<56x64xf32, #tpu.memory_space<vmem>>, vector<18x64xf32>
    %60 = vector.extract_strided_slice %59 {offsets = [0, 0], sizes = [1, 64], strides = [1, 1]} : vector<18x64xf32> to vector<1x64xf32>
    %61 = vector.extract_strided_slice %59 {offsets = [1, 0], sizes = [1, 64], strides = [1, 1]} : vector<18x64xf32> to vector<1x64xf32>
    %62 = vector.extract_strided_slice %59 {offsets = [2, 0], sizes = [1, 64], strides = [1, 1]} : vector<18x64xf32> to vector<1x64xf32>
    %63 = vector.extract_strided_slice %59 {offsets = [3, 0], sizes = [1, 64], strides = [1, 1]} : vector<18x64xf32> to vector<1x64xf32>
    %64 = vector.extract_strided_slice %59 {offsets = [4, 0], sizes = [1, 64], strides = [1, 1]} : vector<18x64xf32> to vector<1x64xf32>
    %65 = vector.extract_strided_slice %59 {offsets = [5, 0], sizes = [1, 64], strides = [1, 1]} : vector<18x64xf32> to vector<1x64xf32>
    %66 = vector.extract_strided_slice %59 {offsets = [6, 0], sizes = [1, 64], strides = [1, 1]} : vector<18x64xf32> to vector<1x64xf32>
    %67 = vector.extract_strided_slice %59 {offsets = [7, 0], sizes = [1, 64], strides = [1, 1]} : vector<18x64xf32> to vector<1x64xf32>
    %68 = vector.extract_strided_slice %59 {offsets = [8, 0], sizes = [1, 64], strides = [1, 1]} : vector<18x64xf32> to vector<1x64xf32>
    %69 = vector.extract_strided_slice %59 {offsets = [9, 0], sizes = [1, 64], strides = [1, 1]} : vector<18x64xf32> to vector<1x64xf32>
    %70 = vector.extract_strided_slice %59 {offsets = [10, 0], sizes = [1, 64], strides = [1, 1]} : vector<18x64xf32> to vector<1x64xf32>
    %71 = vector.extract_strided_slice %59 {offsets = [11, 0], sizes = [1, 64], strides = [1, 1]} : vector<18x64xf32> to vector<1x64xf32>
    %72 = vector.extract_strided_slice %59 {offsets = [12, 0], sizes = [1, 64], strides = [1, 1]} : vector<18x64xf32> to vector<1x64xf32>
    %73 = vector.extract_strided_slice %59 {offsets = [13, 0], sizes = [1, 64], strides = [1, 1]} : vector<18x64xf32> to vector<1x64xf32>
    %74 = vector.extract_strided_slice %59 {offsets = [14, 0], sizes = [1, 64], strides = [1, 1]} : vector<18x64xf32> to vector<1x64xf32>
    %75 = vector.extract_strided_slice %59 {offsets = [15, 0], sizes = [1, 64], strides = [1, 1]} : vector<18x64xf32> to vector<1x64xf32>
    %76 = vector.extract_strided_slice %59 {offsets = [16, 0], sizes = [1, 64], strides = [1, 1]} : vector<18x64xf32> to vector<1x64xf32>
    %77 = vector.extract_strided_slice %59 {offsets = [17, 0], sizes = [1, 64], strides = [1, 1]} : vector<18x64xf32> to vector<1x64xf32>
    %78 = tpu.concatenate %60, %61, %62, %63, %64, %65, %66, %67, %68, %69, %70, %71, %72, %73, %74, %75 in 1 : vector<1x64xf32>, vector<1x64xf32>, vector<1x64xf32>, vector<1x64xf32>, vector<1x64xf32>, vector<1x64xf32>, vector<1x64xf32>, vector<1x64xf32>, vector<1x64xf32>, vector<1x64xf32>, vector<1x64xf32>, vector<1x64xf32>, vector<1x64xf32>, vector<1x64xf32>, vector<1x64xf32>, vector<1x64xf32> -> vector<1x1024xf32>
    %79 = tpu.concatenate %76, %77 in 1 : vector<1x64xf32>, vector<1x64xf32> -> vector<1x128xf32>
    %80 = tpu.concatenate %78, %79 in 1 : vector<1x1024xf32>, vector<1x128xf32> -> vector<1x1152xf32>
    %c25 = arith.constant 25 : index
    %c0_65 = arith.constant 0 : index
    %81 = vector.load %arg3[%c25, %c0_65] : memref<56x64xf32, #tpu.memory_space<vmem>>, vector<18x64xf32>
    %82 = vector.extract_strided_slice %81 {offsets = [0, 0], sizes = [1, 64], strides = [1, 1]} : vector<18x64xf32> to vector<1x64xf32>
    %83 = vector.extract_strided_slice %81 {offsets = [1, 0], sizes = [1, 64], strides = [1, 1]} : vector<18x64xf32> to vector<1x64xf32>
    %84 = vector.extract_strided_slice %81 {offsets = [2, 0], sizes = [1, 64], strides = [1, 1]} : vector<18x64xf32> to vector<1x64xf32>
    %85 = vector.extract_strided_slice %81 {offsets = [3, 0], sizes = [1, 64], strides = [1, 1]} : vector<18x64xf32> to vector<1x64xf32>
    %86 = vector.extract_strided_slice %81 {offsets = [4, 0], sizes = [1, 64], strides = [1, 1]} : vector<18x64xf32> to vector<1x64xf32>
    %87 = vector.extract_strided_slice %81 {offsets = [5, 0], sizes = [1, 64], strides = [1, 1]} : vector<18x64xf32> to vector<1x64xf32>
    %88 = vector.extract_strided_slice %81 {offsets = [6, 0], sizes = [1, 64], strides = [1, 1]} : vector<18x64xf32> to vector<1x64xf32>
    %89 = vector.extract_strided_slice %81 {offsets = [7, 0], sizes = [1, 64], strides = [1, 1]} : vector<18x64xf32> to vector<1x64xf32>
    %90 = vector.extract_strided_slice %81 {offsets = [8, 0], sizes = [1, 64], strides = [1, 1]} : vector<18x64xf32> to vector<1x64xf32>
    %91 = vector.extract_strided_slice %81 {offsets = [9, 0], sizes = [1, 64], strides = [1, 1]} : vector<18x64xf32> to vector<1x64xf32>
    %92 = vector.extract_strided_slice %81 {offsets = [10, 0], sizes = [1, 64], strides = [1, 1]} : vector<18x64xf32> to vector<1x64xf32>
    %93 = vector.extract_strided_slice %81 {offsets = [11, 0], sizes = [1, 64], strides = [1, 1]} : vector<18x64xf32> to vector<1x64xf32>
    %94 = vector.extract_strided_slice %81 {offsets = [12, 0], sizes = [1, 64], strides = [1, 1]} : vector<18x64xf32> to vector<1x64xf32>
    %95 = vector.extract_strided_slice %81 {offsets = [13, 0], sizes = [1, 64], strides = [1, 1]} : vector<18x64xf32> to vector<1x64xf32>
    %96 = vector.extract_strided_slice %81 {offsets = [14, 0], sizes = [1, 64], strides = [1, 1]} : vector<18x64xf32> to vector<1x64xf32>
    %97 = vector.extract_strided_slice %81 {offsets = [15, 0], sizes = [1, 64], strides = [1, 1]} : vector<18x64xf32> to vector<1x64xf32>
    %98 = vector.extract_strided_slice %81 {offsets = [16, 0], sizes = [1, 64], strides = [1, 1]} : vector<18x64xf32> to vector<1x64xf32>
    %99 = vector.extract_strided_slice %81 {offsets = [17, 0], sizes = [1, 64], strides = [1, 1]} : vector<18x64xf32> to vector<1x64xf32>
    %100 = tpu.concatenate %82, %83, %84, %85, %86, %87, %88, %89, %90, %91, %92, %93, %94, %95, %96, %97 in 1 : vector<1x64xf32>, vector<1x64xf32>, vector<1x64xf32>, vector<1x64xf32>, vector<1x64xf32>, vector<1x64xf32>, vector<1x64xf32>, vector<1x64xf32>, vector<1x64xf32>, vector<1x64xf32>, vector<1x64xf32>, vector<1x64xf32>, vector<1x64xf32>, vector<1x64xf32>, vector<1x64xf32>, vector<1x64xf32> -> vector<1x1024xf32>
    %101 = tpu.concatenate %98, %99 in 1 : vector<1x64xf32>, vector<1x64xf32> -> vector<1x128xf32>
    %102 = tpu.concatenate %100, %101 in 1 : vector<1x1024xf32>, vector<1x128xf32> -> vector<1x1152xf32>
    %103 = tpu.concatenate %80, %102 in 0 : vector<1x1152xf32>, vector<1x1152xf32> -> vector<2x1152xf32>
    %c528 = arith.constant 528 : index
    %c0_66 = arith.constant 0 : index
    %104 = vector.load %arg1[%c528, %c0_66] : memref<1824x128xf32, #tpu.memory_space<vmem>>, vector<1152x32xf32>
    %cst_67 = arith.constant dense<0.000000e+00> : vector<2x32xf32>
    %105 = tpu.matmul %103, %104, %cst_67 {dimension_numbers = #tpu.dot_dimension_numbers<[1], [0], [0], [1], [0, 0, 1, 1], [], []>} : vector<2x1152xf32>, vector<1152x32xf32>, vector<2x32xf32> -> vector<2x32xf32>
    %c1680 = arith.constant 1680 : index
    %c0_68 = arith.constant 0 : index
    %106 = vector.load %arg1[%c1680, %c0_68] : memref<1824x128xf32, #tpu.memory_space<vmem>>, vector<1x32xf32>
    %107 = vector.broadcast %106 : vector<1x32xf32> to vector<2x32xf32>
    %108 = arith.addf %105, %107 : vector<2x32xf32>
    %cst_69 = arith.constant 0.000000e+00 : f32
    %109 = vector.broadcast %cst_69 : f32 to vector<2x32xf32>
    %110 = arith.maximumf %108, %109 : vector<2x32xf32>
    %c1688 = arith.constant 1688 : index
    %c0_70 = arith.constant 0 : index
    %111 = vector.load %arg1[%c1688, %c0_70] : memref<1824x128xf32, #tpu.memory_space<vmem>>, vector<32x96xf32>
    %cst_71 = arith.constant dense<0.000000e+00> : vector<2x96xf32>
    %112 = tpu.matmul %110, %111, %cst_71 {dimension_numbers = #tpu.dot_dimension_numbers<[1], [0], [0], [1], [0, 0, 1, 1], [], []>} : vector<2x32xf32>, vector<32x96xf32>, vector<2x96xf32> -> vector<2x96xf32>
    %113 = vector.extract_strided_slice %112 {offsets = [0, 0], sizes = [2, 32], strides = [1, 1]} : vector<2x96xf32> to vector<2x32xf32>
    %114 = arith.negf %113 : vector<2x32xf32>
    %115 = math.exp %114 : vector<2x32xf32>
    %cst_72 = arith.constant 1.000000e+00 : f32
    %116 = vector.broadcast %cst_72 : f32 to vector<2x32xf32>
    %117 = arith.addf %116, %115 : vector<2x32xf32>
    %118 = arith.divf %116, %117 : vector<2x32xf32>
    %119 = vector.extract_strided_slice %112 {offsets = [0, 32], sizes = [2, 32], strides = [1, 1]} : vector<2x96xf32> to vector<2x32xf32>
    %120 = math.tanh %119 : vector<2x32xf32>
    %121 = arith.mulf %118, %120 : vector<2x32xf32>
    %122 = vector.extract_strided_slice %112 {offsets = [0, 64], sizes = [2, 32], strides = [1, 1]} : vector<2x96xf32> to vector<2x32xf32>
    %123 = arith.negf %122 : vector<2x32xf32>
    %124 = math.exp %123 : vector<2x32xf32>
    %cst_73 = arith.constant 1.000000e+00 : f32
    %125 = vector.broadcast %cst_73 : f32 to vector<2x32xf32>
    %126 = arith.addf %125, %124 : vector<2x32xf32>
    %127 = arith.divf %125, %126 : vector<2x32xf32>
    %128 = math.tanh %121 : vector<2x32xf32>
    %129 = arith.mulf %127, %128 : vector<2x32xf32>
    %c1720 = arith.constant 1720 : index
    %c0_74 = arith.constant 0 : index
    %130 = vector.load %arg1[%c1720, %c0_74] : memref<1824x128xf32, #tpu.memory_space<vmem>>, vector<32x96xf32>
    %cst_75 = arith.constant dense<0.000000e+00> : vector<2x96xf32>
    %131 = tpu.matmul %129, %130, %cst_75 {dimension_numbers = #tpu.dot_dimension_numbers<[1], [0], [0], [1], [0, 0, 1, 1], [], []>} : vector<2x32xf32>, vector<32x96xf32>, vector<2x96xf32> -> vector<2x96xf32>
    %132 = vector.extract_strided_slice %131 {offsets = [0, 0], sizes = [2, 32], strides = [1, 1]} : vector<2x96xf32> to vector<2x32xf32>
    %133 = arith.negf %132 : vector<2x32xf32>
    %134 = math.exp %133 : vector<2x32xf32>
    %cst_76 = arith.constant 1.000000e+00 : f32
    %135 = vector.broadcast %cst_76 : f32 to vector<2x32xf32>
    %136 = arith.addf %135, %134 : vector<2x32xf32>
    %137 = arith.divf %135, %136 : vector<2x32xf32>
    %138 = vector.extract_strided_slice %131 {offsets = [0, 32], sizes = [2, 32], strides = [1, 1]} : vector<2x96xf32> to vector<2x32xf32>
    %139 = math.tanh %138 : vector<2x32xf32>
    %140 = arith.mulf %137, %139 : vector<2x32xf32>
    %141 = vector.extract_strided_slice %131 {offsets = [0, 64], sizes = [2, 32], strides = [1, 1]} : vector<2x96xf32> to vector<2x32xf32>
    %142 = arith.negf %141 : vector<2x32xf32>
    %143 = math.exp %142 : vector<2x32xf32>
    %cst_77 = arith.constant 1.000000e+00 : f32
    %144 = vector.broadcast %cst_77 : f32 to vector<2x32xf32>
    %145 = arith.addf %144, %143 : vector<2x32xf32>
    %146 = arith.divf %144, %145 : vector<2x32xf32>
    %147 = math.tanh %140 : vector<2x32xf32>
    %148 = arith.mulf %146, %147 : vector<2x32xf32>
    %c1752 = arith.constant 1752 : index
    %c0_78 = arith.constant 0 : index
    %149 = vector.load %arg1[%c1752, %c0_78] : memref<1824x128xf32, #tpu.memory_space<vmem>>, vector<32x4xf32>
    %cst_79 = arith.constant dense<0.000000e+00> : vector<2x4xf32>
    %150 = tpu.matmul %129, %149, %cst_79 {dimension_numbers = #tpu.dot_dimension_numbers<[1], [0], [0], [1], [0, 0, 1, 1], [], []>} : vector<2x32xf32>, vector<32x4xf32>, vector<2x4xf32> -> vector<2x4xf32>
    %c1784 = arith.constant 1784 : index
    %c0_80 = arith.constant 0 : index
    %151 = vector.load %arg1[%c1784, %c0_80] : memref<1824x128xf32, #tpu.memory_space<vmem>>, vector<32x4xf32>
    %cst_81 = arith.constant dense<0.000000e+00> : vector<2x4xf32>
    %152 = tpu.matmul %148, %151, %cst_81 {dimension_numbers = #tpu.dot_dimension_numbers<[1], [0], [0], [1], [0, 0, 1, 1], [], []>} : vector<2x32xf32>, vector<32x4xf32>, vector<2x4xf32> -> vector<2x4xf32>
    %153 = arith.addf %150, %152 : vector<2x4xf32>
    %c1816 = arith.constant 1816 : index
    %c0_82 = arith.constant 0 : index
    %154 = vector.load %arg1[%c1816, %c0_82] : memref<1824x128xf32, #tpu.memory_space<vmem>>, vector<1x4xf32>
    %155 = vector.broadcast %154 : vector<1x4xf32> to vector<2x4xf32>
    %156 = arith.addf %153, %155 : vector<2x4xf32>
    %c0_83 = arith.constant 0 : index
    %c0_84 = arith.constant 0 : index
    %157 = vector.load %arg2[%c0_83, %c0_84] : memref<2x4xf32, #tpu.memory_space<vmem>>, vector<2x4xf32>
    tpu.vector_store %arg2[%c0_83, %c0_84], %156 {strides = array<i32>} : memref<2x4xf32, #tpu.memory_space<vmem>>, vector<2x4xf32>,
    return
  }
}

</mosaic_0001>

<bundles_post_ra>
// kernel: run_model.1
= control target key start
LH: loop header
LB: loop body
LE: loop exit
PB: predicated region body
PF: predicated region fallthrough
CT: control target
= control target key end

     0   :  { %s2635_s13 = smov 8   ;;  %s2636_s14 = smov 4   ;;  %vm126_vm0 = vcmask 1043456   ;;  %vm2637_vm1 = vmmov 1   ;;  %s3729_s0 = inlined_call_operand.vmem [shape: f32[56,4], index: 0, kind: input, shape index: {}]   ;;  %s3730_s1 = inlined_call_operand.vmem [shape: f32[1824,128], index: 1, kind: input, shape index: {}]   ;;  %s3731_s2 = inlined_call_operand.hbm [shape: f32[2,4], index: 2, kind: output, shape index: {}]  }
   0x1   :  { %v32_v0 = vld [vmem:[%s3729_s0 + $0x2] sm:$0xff]  ;;  %v33_v2 = vld [vmem:[%s3729_s0 + $0xa] sm:$0xff]  ;;  %vm2268_vm2 = vmpackc.low %vm126_vm0, %vm2637_vm1 }
   0x2   :  { %v26_v1 = vld [vmem:[%s3729_s0 + $0x1] sm:$0xff]  ;;  %68 = vrot.lane.b32.xlu1 %v32_v0, %s2635_s13  ;;  %v27_v3 = vld [vmem:[%s3729_s0 + $0x9] sm:$0xff]  ;;  %v29_v6 = vld [vmem:[%s3729_s0 + $0x19] sm:$0xff] }
   0x3   :  { %44 = vrot.lane.b32.xlu0 %v26_v1, %s2636_s14  ;;  %v100_v4 = vld [vmem:[%s3730_s1] sm:$0xff]  ;;  %v101_v5 = vld [vmem:[%s3730_s1 + $0x8] sm:$0xf]  ;;  %v28_v7 = vld [vmem:[%s3729_s0 + $0x11] sm:$0xff] }
   0x4   :  { %v2267_v8 = vpack.c.bf16 %v101_v5, %v100_v4 }
   0x6   :  { %70 = vrot.lane.b32.xlu1 %v33_v2, %s2635_s13 }
   0x7   :  { %46 = vrot.lane.b32.xlu0 %v27_v3, %s2636_s14 }
   0x8   :  { %7 = vsyncpa [#allocation4], 0  ;;  %2269 = vmatprep.subr.msk.bf16.mxu0 %vm2268_vm2, %v2267_v8  ;;  %v35_v9 = vld [vmem:[%s3729_s0 + $0x1a] sm:$0xff]  ;;  %v34_v10 = vld [vmem:[%s3729_s0 + $0x12] sm:$0xff]  ;;  %vm12_vm3 = vcmask 523264   ;;  %v2638_v11 = vmov 0.0  }
   0x9   :  { %2272 = vmatpush3.bf16.msk.msra.mxu0 %vm2268_vm2, %v2267_v8  ;;  %14 = vst.msk [vmem:[#allocation2 + $0x8] sm:$0xff] %vm12_vm3, %v2638_v11  ;;  %15 = vst.msk [vmem:[#allocation2 + $0x10] sm:$0xff] %vm12_vm3, %v2638_v11  ;;  %v31_v12 = vld [vmem:[%s3729_s0 + $0x29] sm:$0xff]  ;;  %v30_v13 = vld [vmem:[%s3729_s0 + $0x21] sm:$0xff]  ;;  %vm86_vm4 = vcmask 31744   ;;  %vm93_vm5 = vcmask 64512  }
   0xa   :  { %50 = vrot.lane.b32.xlu1 %v29_v6, %s2636_s14  ;;  %13 = vst.msk [vmem:[#allocation2] sm:$0xff] %vm12_vm3, %v2638_v11  ;;  %16 = vst.msk [vmem:[#allocation2 + $0x18] sm:$0xff] %vm12_vm3, %v2638_v11  ;;  %v37_v14 = vld [vmem:[%s3729_s0 + $0x2a] sm:$0xff]  ;;  %v36_v15 = vld [vmem:[%s3729_s0 + $0x22] sm:$0xff]  ;;  %vm107_vm6 = vcmask 97280   ;;  %vm231_vm7 = vcmask 261120  }
   0xb   :  { %48 = vrot.lane.b32.xlu0 %v28_v7, %s2636_s14  ;;  %17 = vst.msk [vmem:[#allocation2 + $0x20] sm:$0xff] %vm12_vm3, %v2638_v11  ;;  %18 = vst.msk [vmem:[#allocation2 + $0x28] sm:$0xff] %vm12_vm3, %v2638_v11  ;;  %v20_v16 = vld [vmem:[%s3729_s0] sm:$0xff]  ;;  %v21_v21 = vld [vmem:[%s3729_s0 + $0x8] sm:$0xff]  ;;  %vm238_vm8 = vcmask 521216   ;;  %s2639_s20 = smov 32  }
   0xc   :  { %19 = vst.msk [vmem:[#allocation2 + $0x30] sm:$0xff] %vm12_vm3, %v2638_v11  ;;  %v23_v28 = vld [vmem:[%s3729_s0 + $0x18] sm:$0xff]  ;;  %v22_v29 = vld [vmem:[%s3729_s0 + $0x10] sm:$0xff]  ;;  %v25_v38 = vld [vmem:[%s3729_s0 + $0x28] sm:$0xff]  ;;  %s2640_s21 = smov 64   ;;  %vm336_vm9 = vcmask 785408  }
   0xd   :  { %v24_v39 = vld [vmem:[%s3729_s0 + $0x20] sm:$0xff]  ;;  %v319_v46 = vld [vmem:[%s3730_s1 + $0x18] sm:$0xff]  ;;  %v321_v48 = vld [vmem:[%s3730_s1 + $0x28] sm:$0xff]  ;;  %vm1025_vm10 = vcmask 1040384   ;;  %vm2642_vm11 = vmmov 0   ;;  %s2643_s29 = smov 96  }
   0xe   :  { %74 = vrot.lane.b32.xlu1 %v35_v9, %s2635_s13  ;;  %v320_v47 = vld [vmem:[%s3730_s1 + $0x20] sm:$0xff]  ;;  %v322_v50 = vld [vmem:[%s3730_s1 + $0x30] sm:$0xff]  ;;  %v323_v52 = vld [vmem:[%s3730_s1 + $0x38] sm:$0xff]  ;;  %s2644_s28 = smov [#allocation3]   ;;  %vm1886_vm12 = vcmask 25600  }
   0xf   :  { %72 = vrot.lane.b32.xlu0 %v34_v10, %s2635_s13  ;;  %v2273_v49 = vpack.c.bf16 %v320_v47, %v319_v46  ;;  %v2277_v51 = vpack.c.bf16 %v322_v50, %v321_v48  ;;  %v324_v53 = vld [vmem:[%s3730_s1 + $0x40] sm:$0xff]  ;;  %v325_v55 = vld [vmem:[%s3730_s1 + $0x48] sm:$0xff]  ;;  %v326_v56 = vld [vmem:[%s3730_s1 + $0x50] sm:$0xff] }
  0x10   :  { %v2281_v54 = vpack.c.bf16 %v324_v53, %v323_v52  ;;  %v2285_v57 = vpack.c.bf16 %v326_v56, %v325_v55  ;;  %v1902_v58 = vld [vmem:[%s3730_s1 + $0x10] ss:$0 sm:$0xff]  ;;  %v327_v60 = vld [vmem:[%s3730_s1 + $0x58] sm:$0xff]  ;;  %v328_v61 = vld [vmem:[%s3730_s1 + $0x60] sm:$0xff] }
  0x11   :  { %2274 = vmatprep.subr.bf16.mxu1 %v2273_v49  ;;  %v2289_v0 = vpack.c.bf16 %v328_v61, %v327_v60  ;;  %v329_v4 = vld [vmem:[%s3730_s1 + $0x68] sm:$0xff]  ;;  %v330_v5 = vld [vmem:[%s3730_s1 + $0x70] sm:$0xff] }
  0x12   :  { %54 = vrot.lane.b32.xlu1 %v31_v12, %s2636_s14  ;;  %2276 = vmatpush3.bf16.msra.mxu1 %v2273_v49  ;;  %v2293_v6 = vpack.c.bf16 %v330_v5, %v329_v4  ;;  %v516_v5 = vld [vmem:[%s3730_s1 + $0xa0] sm:$0xff] }
  0x13   :  { %52 = vrot.lane.b32.xlu0 %v30_v13, %s2636_s14  ;;  %2278 = vmatprep.subr.bf16.mxu1 %v2277_v51 }
  0x16   :  { %78 = vrot.lane.b32.xlu1 %v37_v14, %s2635_s13  ;;  %2280 = vmatpush3.bf16.msra.mxu1 %v2277_v51 }
  0x17   :  { %76 = vrot.lane.b32.xlu0 %v36_v15, %s2635_s13  ;;  %2282 = vmatprep.subr.bf16.mxu1 %v2281_v54 }
  0x1a   :  { %2284 = vmatpush3.bf16.msra.mxu1 %v2281_v54 }
  0x1b   :  { %2286 = vmatprep.subr.bf16.mxu1 %v2285_v57 }
  0x1e   :  { %2288 = vmatpush3.bf16.msra.mxu1 %v2285_v57 }
  0x1f   :  { %2290 = vmatprep.subr.bf16.mxu1 %v2289_v0 }
  0x22   :  { %2292 = vmatpush3.bf16.msra.mxu1 %v2289_v0  ;;  %v514_v0 = vld [vmem:[%s3730_s1 + $0x90] sm:$0xff] }
  0x23   :  { %2294 = vmatprep.subr.bf16.mxu1 %v2293_v6 }
  0x26   :  { %2296 = vmatpush3.bf16.msra.mxu1 %v2293_v6  ;;  %v517_v6 = vld [vmem:[%s3730_s1 + $0xa8] sm:$0xff] }
  0x74   :  { %v69_v17 = vpop.permute.xlu1 %68 }
  0x75   :  { %v45_v18 = vpop.permute.xlu0 %44 }
  0x76   :  { %v87_v19 = vsel %vm86_vm4, %v20_v16, %v45_v18 }
  0x77   :  { %v94_v20 = vsel %vm93_vm5, %v87_v19, %v69_v17 }
  0x78   :  { %2146 = vmatprep.mubr.msk.f32.mxu0 %vm107_vm6, %v94_v20  ;;  %v71_v22 = vpop.permute.xlu1 %70 }
  0x79   :  { %v47_v23 = vpop.permute.xlu0 %46 }
  0x7a   :  { %v88_v24 = vsel %vm86_vm4, %v21_v21, %v47_v23 }
  0x7b   :  { %v95_v25 = vsel %vm93_vm5, %v88_v24, %v71_v22 }
  0x7c   :  { %2147 = vmatmul.mubr.msk.f32.vlgmr.msra.gmra.mrb[0].mxu0 %vm107_vm6, %v95_v25  ;;  %v51_v26 = vpop.permute.xlu1 %50 }
  0x7d   :  { %v49_v27 = vpop.permute.xlu0 %48  ;;  %v90_v30 = vsel %vm86_vm4, %v23_v28, %v51_v26 }
  0x7e   :  { %v89_v31 = vsel %vm86_vm4, %v22_v29, %v49_v27 }
  0x80   :  { %v75_v32 = vpop.permute.xlu1 %74 }
  0x81   :  { %v73_v33 = vpop.permute.xlu0 %72  ;;  %v97_v34 = vsel %vm93_vm5, %v90_v30, %v75_v32 }
  0x82   :  { %v96_v35 = vsel %vm93_vm5, %v89_v31, %v73_v33 }
  0x83   :  { %2149 = vmatprep.mubr.msk.f32.mxu0 %vm107_vm6, %v96_v35 }
  0x84   :  { %2150 = vmatmul.mubr.msk.f32.gmra.mrb[2].mxu0 %vm107_vm6, %v97_v34  ;;  %v55_v36 = vpop.permute.xlu1 %54 }
  0x85   :  { %v53_v37 = vpop.permute.xlu0 %52  ;;  %v92_v40 = vsel %vm86_vm4, %v25_v38, %v55_v36 }
  0x86   :  { %v91_v41 = vsel %vm86_vm4, %v24_v39, %v53_v37 }
  0x88   :  { %v79_v42 = vpop.permute.xlu1 %78 }
  0x89   :  { %v77_v43 = vpop.permute.xlu0 %76  ;;  %v99_v44 = vsel %vm93_vm5, %v92_v40, %v79_v42 }
  0x8a   :  { %v98_v45 = vsel %vm93_vm5, %v91_v41, %v77_v43 }
  0x8b   :  { %2152 = vmatprep.mubr.msk.f32.mxu0 %vm107_vm6, %v98_v45 }
  0x8c   :  { %2153 = vmatmul.mubr.msk.f32.gmra.mrb[4].mxu0 %vm107_vm6, %v99_v44 }
 0x14f   :  { %v2148_v59 = vpop.f32.mrb[0].mxu0 }
 0x150   :  { %v202_v62 = vadd.f32 %v2148_v59, %v1902_v58  ;;  %v196_v63 = vpop.f32.mrb[1].mxu0 }
 0x151   :  { %v197_v1 = vadd.f32 %v1902_v58, %v196_v63  ;;  %v513_v63 = vld [vmem:[%s3730_s1 + $0x88] sm:$0xff] }
 0x152   :  { %v226_v2 = vmax.f32 %v202_v62, 0.0  ;;  %v512_v62 = vld [vmem:[%s3730_s1 + $0x80] sm:$0xff] }
 0x153   :  { %v225_v3 = vmax.f32 %v197_v1, 0.0  ;;  %v2641_v1 = vmov 0.0|0.0  }
 0x154   :  { %233 = vst.msk [vmem:[#allocation2 + $0x9] sm:$0xff] %vm231_vm7, %v226_v2  ;;  %2297 = vmatprep.subr.bf16.mxu0 %v2641_v1  ;;  %v2298_v2 = vpack.c.bf16 %v513_v63, %v512_v62  ;;  %2333 = vmatprep.subr.bf16.mxu1 %v2641_v1 }
 0x155   :  { %232 = vst.msk [vmem:[#allocation2 + $0x1] sm:$0xff] %vm231_vm7, %v225_v3  ;;  %v515_v3 = vld [vmem:[%s3730_s1 + $0x98] sm:$0xff] }
 0x156   :  { %2299 = vmatpush1.bf16.msra.mxu0 %v2298_v2  ;;  %v2301_v4 = vpack.c.bf16 %v515_v3, %v514_v0 }
 0x157   :  { %v2151_v7 = vpop.f32.mrb[2].mxu0  ;;  %2300 = vmatprep.subr.bf16.mxu0 %v2641_v1 }
 0x158   :  { %v212_v8 = vadd.f32 %v2151_v7, %v1902_v58  ;;  %v206_v9 = vpop.f32.mrb[3].mxu0  ;;  %v2304_v7 = vpack.c.bf16 %v517_v6, %v516_v5 }
 0x159   :  { %v207_v10 = vadd.f32 %v1902_v58, %v206_v9  ;;  %v519_v9 = vld [vmem:[%s3730_s1 + $0xb8] sm:$0xff] }
 0x15a   :  { %v228_v12 = vmax.f32 %v212_v8, 0.0  ;;  %2302 = vmatpush1.bf16.msra.mxu0 %v2301_v4  ;;  %v518_v8 = vld [vmem:[%s3730_s1 + $0xb0] sm:$0xff] }
 0x15b   :  { %v227_v13 = vmax.f32 %v207_v10, 0.0  ;;  %v248_v14 = vld [vmem:[#allocation2 + $0x9] sm:$0xff]  ;;  %2303 = vmatprep.subr.bf16.mxu0 %v2641_v1  ;;  %v2307_v10 = vpack.c.bf16 %v519_v9, %v518_v8 }
 0x15c   :  { %235 = vst.msk [vmem:[#allocation2 + $0x19] sm:$0xff] %vm231_vm7, %v228_v12  ;;  %267 = vrot.lane.b32.xlu1 %v248_v14, %s2639_s20  ;;  %v247_v15 = vld [vmem:[#allocation2 + $0x1] sm:$0xff] }
 0x15d   :  { %234 = vst.msk [vmem:[#allocation2 + $0x11] sm:$0xff] %vm231_vm7, %v227_v13  ;;  %265 = vrot.lane.b32.xlu0 %v247_v15, %s2639_s20  ;;  %v253_v19 = vld [vmem:[#allocation2 + $0x2] sm:$0xff]  ;;  %v522_v15 = vld [vmem:[%s3730_s1 + $0xd0] sm:$0xff] }
 0x15e   :  { %239 = vst.msk [vmem:[#allocation2 + $0x13] sm:$0x3f] %vm238_vm8, %v2638_v11  ;;  %v241_v33 = vld [vmem:[#allocation2] sm:$0xff]  ;;  %v242_v38 = vld [vmem:[#allocation2 + $0x8] sm:$0xff]  ;;  %2305 = vmatpush1.bf16.msra.mxu0 %v2304_v7 }
 0x15f   :  { %v2154_v16 = vpop.f32.mrb[4].mxu0  ;;  %2306 = vmatprep.subr.bf16.mxu0 %v2641_v1  ;;  %v520_v12 = vld [vmem:[%s3730_s1 + $0xc0] sm:$0xff]  ;;  %v521_v13 = vld [vmem:[%s3730_s1 + $0xc8] sm:$0xff] }
 0x160   :  { %v222_v17 = vadd.f32 %v2154_v16, %v1902_v58  ;;  %v216_v18 = vpop.f32.mrb[5].mxu0  ;;  %v2310_v14 = vpack.c.bf16 %v521_v13, %v520_v12  ;;  %v523_v16 = vld [vmem:[%s3730_s1 + $0xd8] sm:$0xff] }
 0x161   :  { %v217_v20 = vadd.f32 %v1902_v58, %v216_v18  ;;  %289 = vrot.lane.b32.xlu0 %v253_v19, %s2640_s21  ;;  %v524_v18 = vld [vmem:[%s3730_s1 + $0xe0] sm:$0xff]  ;;  %v525_v19 = vld [vmem:[%s3730_s1 + $0xe8] sm:$0xff] }
 0x162   :  { %v230_v21 = vmax.f32 %v222_v17, 0.0  ;;  %2308 = vmatpush1.bf16.msra.mxu0 %v2307_v10  ;;  %v2313_v17 = vpack.c.bf16 %v523_v16, %v522_v15 }
 0x163   :  { %v229_v22 = vmax.f32 %v217_v20, 0.0  ;;  %v250_v25 = vld [vmem:[#allocation2 + $0x19] sm:$0xff]  ;;  %2309 = vmatprep.subr.bf16.mxu0 %v2641_v1  ;;  %v2316_v20 = vpack.c.bf16 %v525_v19, %v524_v18 }
 0x164   :  { %237 = vst.msk [vmem:[#allocation2 + $0x29] sm:$0xff] %vm231_vm7, %v230_v21  ;;  %v254_v23 = vld [vmem:[#allocation2 + $0xa] sm:$0xff] }
 0x165   :  { %240 = vst.msk [vmem:[#allocation2 + $0x2b] sm:$0x3f] %vm238_vm8, %v2638_v11  ;;  %291 = vrot.lane.b32.xlu1 %v254_v23, %s2640_s21  ;;  %v249_v24 = vld [vmem:[#allocation2 + $0x11] sm:$0xff] }
 0x166   :  { %236 = vst.msk [vmem:[#allocation2 + $0x21] sm:$0xff] %vm231_vm7, %v229_v22  ;;  %269 = vrot.lane.b32.xlu0 %v249_v24, %s2639_s20  ;;  %v255_v26 = vld [vmem:[#allocation2 + $0x12] sm:$0xff]  ;;  %2311 = vmatpush1.bf16.msra.mxu0 %v2310_v14  ;;  %v528_v24 = vld [vmem:[%s3730_s1 + $0x100] sm:$0xff] }
 0x167   :  { %v243_v43 = vld [vmem:[#allocation2 + $0x10] sm:$0xff]  ;;  %v244_v48 = vld [vmem:[#allocation2 + $0x18] sm:$0xff]  ;;  %2312 = vmatprep.subr.bf16.mxu0 %v2641_v1 }
 0x168   :  { %v526_v21 = vld [vmem:[%s3730_s1 + $0xf0] sm:$0xff]  ;;  %v527_v22 = vld [vmem:[%s3730_s1 + $0xf8] sm:$0xff] }
 0x169   :  { %271 = vrot.lane.b32.xlu1 %v250_v25, %s2639_s20  ;;  %v2319_v23 = vpack.c.bf16 %v527_v22, %v526_v21  ;;  %v529_v25 = vld [vmem:[%s3730_s1 + $0x108] sm:$0xff] }
 0x16a   :  { %293 = vrot.lane.b32.xlu0 %v255_v26, %s2640_s21  ;;  %2314 = vmatpush1.bf16.msra.mxu0 %v2313_v17  ;;  %v2322_v26 = vpack.c.bf16 %v529_v25, %v528_v24  ;;  %v717_v24 = vld [vmem:[%s3730_s1 + $0x150] sm:$0xff]  ;;  %v718_v25 = vld [vmem:[%s3730_s1 + $0x158] sm:$0xff] }
 0x16b   :  { %2315 = vmatprep.subr.bf16.mxu0 %v2641_v1 }
 0x16c   :  { %v252_v29 = vld [vmem:[#allocation2 + $0x29] sm:$0xff] }
 0x16d   :  { %v256_v27 = vld [vmem:[#allocation2 + $0x1a] sm:$0xff]  ;;  %v257_v30 = vld [vmem:[#allocation2 + $0x22] sm:$0xff]  ;;  %v258_v31 = vld [vmem:[#allocation2 + $0x2a] sm:$0xff] }
 0x16e   :  { %v251_v28 = vld [vmem:[#allocation2 + $0x21] sm:$0xff]  ;;  %295 = vrot.lane.b32.xlu1 %v256_v27, %s2640_s21  ;;  %2317 = vmatpush1.bf16.msra.mxu0 %v2316_v20  ;;  %v530_v27 = vld [vmem:[%s3730_s1 + $0x110] sm:$0xff] }
 0x16f   :  { %273 = vrot.lane.b32.xlu0 %v251_v28, %s2639_s20  ;;  %v245_v53 = vld [vmem:[#allocation2 + $0x20] sm:$0xff]  ;;  %v246_v58 = vld [vmem:[#allocation2 + $0x28] sm:$0xff]  ;;  %2318 = vmatprep.subr.bf16.mxu0 %v2641_v1  ;;  %v531_v28 = vld [vmem:[%s3730_s1 + $0x118] sm:$0xff] }
 0x172   :  { %275 = vrot.lane.b32.xlu1 %v252_v29, %s2639_s20  ;;  %2320 = vmatpush1.bf16.msra.mxu0 %v2319_v23  ;;  %v2325_v29 = vpack.c.bf16 %v531_v28, %v530_v27  ;;  %v716_v23 = vld [vmem:[%s3730_s1 + $0x148] sm:$0xff]  ;;  %v719_v27 = vld [vmem:[%s3730_s1 + $0x160] sm:$0xff] }
 0x173   :  { %297 = vrot.lane.b32.xlu0 %v257_v30, %s2640_s21  ;;  %2321 = vmatprep.subr.bf16.mxu0 %v2641_v1  ;;  %v532_v30 = vld [vmem:[%s3730_s1 + $0x120] sm:$0xff]  ;;  %v2337_v28 = vpack.c.bf16 %v719_v27, %v718_v25 }
 0x176   :  { %299 = vrot.lane.b32.xlu1 %v258_v31, %s2640_s21  ;;  %2323 = vmatpush1.bf16.msra.mxu0 %v2322_v26  ;;  %v533_v31 = vld [vmem:[%s3730_s1 + $0x128] sm:$0xff]  ;;  %v2334_v26 = vpack.c.bf16 %v717_v24, %v716_v23 }
 0x177   :  { %2324 = vmatprep.subr.bf16.mxu0 %v2641_v1 }
 0x17a   :  { %2326 = vmatpush1.bf16.msra.mxu0 %v2325_v29  ;;  %v720_v29 = vld [vmem:[%s3730_s1 + $0x168] sm:$0xff] }
 0x17b   :  { %2327 = vmatprep.subr.bf16.mxu0 %v2641_v1 }
 0x1ce   :  { %v268_v34 = vpop.permute.xlu1 %267 }
 0x1cf   :  { %v266_v32 = vpop.permute.xlu0 %265  ;;  %v308_v39 = vsel %vm231_vm7, %v242_v38, %v268_v34  ;;  %v535_v34 = vld [vmem:[%s3730_s1 + $0x138] sm:$0xff] }
 0x1d0   :  { %v307_v35 = vsel %vm231_vm7, %v241_v33, %v266_v32  ;;  %v2328_v32 = vpack.c.bf16 %v533_v31, %v532_v30  ;;  %v534_v33 = vld [vmem:[%s3730_s1 + $0x130] sm:$0xff] }
 0x1d1   :  { %v721_v30 = vld [vmem:[%s3730_s1 + $0x170] sm:$0xff] }
 0x1d2   :  { %2329 = vmatpush1.bf16.msra.mxu0 %v2328_v32  ;;  %v2340_v31 = vpack.c.bf16 %v721_v30, %v720_v29  ;;  %v722_v32 = vld [vmem:[%s3730_s1 + $0x178] sm:$0xff] }
 0x1d3   :  { %v290_v36 = vpop.permute.xlu0 %289  ;;  %2330 = vmatprep.subr.bf16.mxu0 %v2641_v1 }
 0x1d4   :  { %v313_v37 = vsel %vm12_vm3, %v307_v35, %v290_v36  ;;  %v2331_v35 = vpack.c.bf16 %v535_v34, %v534_v33  ;;  %v1910_v36 = vld [vmem:[%s3730_s1 + $0x78] ss:$0 sm:$0xff]  ;;  %v723_v33 = vld [vmem:[%s3730_s1 + $0x180] sm:$0xff] }
 0x1d5   :  { %2179 = vmatprep.mubr.msk.f32.mxu1 %vm336_vm9, %v313_v37  ;;  %v2343_v34 = vpack.c.bf16 %v723_v33, %v722_v32 }
 0x1d6   :  { %2332 = vmatpush1.bf16.msra.mxu0 %v2331_v35  ;;  %v724_v35 = vld [vmem:[%s3730_s1 + $0x188] sm:$0xff] }
 0x1d7   :  { %v292_v40 = vpop.permute.xlu1 %291 }
 0x1d8   :  { %v314_v41 = vsel %vm12_vm3, %v308_v39, %v292_v40  ;;  %v270_v42 = vpop.permute.xlu0 %269 }
 0x1d9   :  { %2180 = vmatmul.mubr.msk.f32.vlgmr.msra.gmra.mrb[0].mxu1 %vm336_vm9, %v314_v41  ;;  %v309_v45 = vsel %vm231_vm7, %v243_v43, %v270_v42 }
 0x1da   :  { %2335 = vmatpush1.bf16.msra.mxu1 %v2334_v26 }
 0x1db   :  { %v272_v44 = vpop.permute.xlu1 %271  ;;  %2336 = vmatprep.subr.bf16.mxu1 %v2641_v1 }
 0x1dc   :  { %v294_v46 = vpop.permute.xlu0 %293  ;;  %v310_v49 = vsel %vm231_vm7, %v244_v48, %v272_v44 }
 0x1dd   :  { %v315_v47 = vsel %vm12_vm3, %v309_v45, %v294_v46 }
 0x1de   :  { %2182 = vmatprep.mubr.msk.f32.mxu1 %vm336_vm9, %v315_v47  ;;  %2338 = vmatpush1.bf16.msra.mxu1 %v2337_v28 }
 0x1df   :  { %2339 = vmatprep.subr.bf16.mxu1 %v2641_v1 }
 0x1e0   :  { %v296_v50 = vpop.permute.xlu1 %295 }
 0x1e1   :  { %v316_v51 = vsel %vm12_vm3, %v310_v49, %v296_v50  ;;  %v274_v52 = vpop.permute.xlu0 %273 }
 0x1e2   :  { %2183 = vmatmul.mubr.msk.f32.gmra.mrb[2].mxu1 %vm336_vm9, %v316_v51  ;;  %v311_v55 = vsel %vm231_vm7, %v245_v53, %v274_v52 }
 0x1e3   :  { %2341 = vmatpush1.bf16.msra.mxu1 %v2340_v31 }
 0x1e4   :  { %v276_v54 = vpop.permute.xlu1 %275  ;;  %2342 = vmatprep.subr.bf16.mxu1 %v2641_v1 }
 0x1e5   :  { %v298_v56 = vpop.permute.xlu0 %297  ;;  %v312_v59 = vsel %vm231_vm7, %v246_v58, %v276_v54 }
 0x1e6   :  { %v317_v57 = vsel %vm12_vm3, %v311_v55, %v298_v56 }
 0x1e7   :  { %2185 = vmatprep.mubr.msk.f32.mxu1 %vm336_vm9, %v317_v57  ;;  %2344 = vmatpush1.bf16.msra.mxu1 %v2343_v34 }
 0x1e8   :  { %v300_v60 = vpop.permute.xlu1 %299  ;;  %2345 = vmatprep.subr.bf16.mxu1 %v2641_v1 }
 0x1e9   :  { %v318_v61 = vsel %vm12_vm3, %v312_v59, %v300_v60 }
 0x1ea   :  { %2186 = vmatmul.mubr.msk.f32.gmra.mrb[4].mxu1 %vm336_vm9, %v318_v61 }
 0x2ac   :  { %v2181_v37 = vpop.f32.mrb[0].mxu1 }
 0x2ad   :  { %v427_v38 = vadd.f32 %v2181_v37, %v1910_v36  ;;  %v421_v39 = vpop.f32.mrb[1].mxu1 }
 0x2ae   :  { %v422_v40 = vadd.f32 %v1910_v36, %v421_v39  ;;  %v727_v39 = vld [vmem:[%s3730_s1 + $0x1a0] sm:$0xff] }
 0x2af   :  { %v451_v41 = vmax.f32 %v427_v38, 0.0  ;;  %v726_v38 = vld [vmem:[%s3730_s1 + $0x198] sm:$0xff] }
 0x2b0   :  { %v450_v42 = vmax.f32 %v422_v40, 0.0  ;;  %v2349_v40 = vpack.c.bf16 %v727_v39, %v726_v38 }
 0x2b1   :  { %457 = vst.msk [vmem:[#allocation2 + $0x9] sm:$0xff] %vm12_vm3, %v451_v41  ;;  %v728_v41 = vld [vmem:[%s3730_s1 + $0x1a8] sm:$0xff] }
 0x2b2   :  { %456 = vst.msk [vmem:[#allocation2 + $0x1] sm:$0xff] %vm12_vm3, %v450_v42  ;;  %v729_v42 = vld [vmem:[%s3730_s1 + $0x1b0] sm:$0xff] }
 0x2b5   :  { %v2184_v43 = vpop.f32.mrb[2].mxu1 }
 0x2b6   :  { %v437_v44 = vadd.f32 %v2184_v43, %v1910_v36  ;;  %v431_v45 = vpop.f32.mrb[3].mxu1  ;;  %v2352_v43 = vpack.c.bf16 %v729_v42, %v728_v41 }
 0x2b7   :  { %v432_v46 = vadd.f32 %v1910_v36, %v431_v45  ;;  %v731_v45 = vld [vmem:[%s3730_s1 + $0x1c0] sm:$0xff] }
 0x2b8   :  { %v453_v47 = vmax.f32 %v437_v44, 0.0  ;;  %v471_v49 = vld [vmem:[#allocation2 + $0x9] sm:$0xff]  ;;  %v730_v44 = vld [vmem:[%s3730_s1 + $0x1b8] sm:$0xff] }
 0x2b9   :  { %v452_v48 = vmax.f32 %v432_v46, 0.0  ;;  %490 = vrot.lane.b32.xlu1 %v471_v49, %s2640_s21  ;;  %v476_v50 = vld [vmem:[#allocation2 + $0x2] sm:$0xff]  ;;  %v2355_v46 = vpack.c.bf16 %v731_v45, %v730_v44 }
 0x2ba   :  { %459 = vst.msk [vmem:[#allocation2 + $0x19] sm:$0xff] %vm12_vm3, %v453_v47  ;;  %v470_v51 = vld [vmem:[#allocation2 + $0x1] sm:$0xff]  ;;  %1918 = vmatprep.mubr.msk.f32.mxu0 %vm12_vm3, %v476_v50  ;;  %v734_v50 = vld [vmem:[%s3730_s1 + $0x1d8] sm:$0xff] }
 0x2bb   :  { %458 = vst.msk [vmem:[#allocation2 + $0x11] sm:$0xff] %vm12_vm3, %v452_v48  ;;  %488 = vrot.lane.b32.xlu0 %v470_v51, %s2640_s21  ;;  %v464_v63 = vld [vmem:[#allocation2] sm:$0xff]  ;;  %v465_v4 = vld [vmem:[#allocation2 + $0x8] sm:$0xff]  ;;  %v733_v48 = vld [vmem:[%s3730_s1 + $0x1d0] sm:$0xff] }
 0x2bc   :  { %462 = vst.msk [vmem:[#allocation2 + $0x13] sm:$0x3f] %vm238_vm8, %v2638_v11  ;;  %v732_v47 = vld [vmem:[%s3730_s1 + $0x1c8] sm:$0xff]  ;;  %v735_v51 = vld [vmem:[%s3730_s1 + $0x1e0] sm:$0xff] }
 0x2bd   :  { %v2187_v52 = vpop.f32.mrb[4].mxu1  ;;  %v2358_v49 = vpack.c.bf16 %v733_v48, %v732_v47 }
 0x2be   :  { %v447_v53 = vadd.f32 %v2187_v52, %v1910_v36  ;;  %v441_v54 = vpop.f32.mrb[5].mxu1  ;;  %v2361_v52 = vpack.c.bf16 %v735_v51, %v734_v50 }
 0x2bf   :  { %v442_v55 = vadd.f32 %v1910_v36, %v441_v54  ;;  %v725_v36 = vld [vmem:[%s3730_s1 + $0x190] sm:$0xff] }
 0x2c0   :  { %v455_v56 = vmax.f32 %v447_v53, 0.0  ;;  %v2346_v37 = vpack.c.bf16 %v725_v36, %v724_v35  ;;  %v736_v53 = vld [vmem:[%s3730_s1 + $0x1e8] sm:$0xff]  ;;  %v737_v54 = vld [vmem:[%s3730_s1 + $0x1f0] sm:$0xff] }
 0x2c1   :  { %v454_v57 = vmax.f32 %v442_v55, 0.0  ;;  %v473_v58 = vld [vmem:[#allocation2 + $0x19] sm:$0xff]  ;;  %v2364_v55 = vpack.c.bf16 %v737_v54, %v736_v53  ;;  %v1035_v54 = vld [vmem:[%s3730_s1 + $0x210] sm:$0xff] }
 0x2c2   :  { %461 = vst.msk [vmem:[#allocation2 + $0x29] sm:$0xff] %vm12_vm3, %v455_v56  ;;  %494 = vrot.lane.b32.xlu1 %v473_v58, %s2640_s21  ;;  %v477_v3 = vld [vmem:[#allocation2 + $0xa] sm:$0xff]  ;;  %2347 = vmatpush1.bf16.msra.mxu1 %v2346_v37  ;;  %v738_v56 = vld [vmem:[%s3730_s1 + $0x1f8] sm:$0xff] }
 0x2c3   :  { %463 = vst.msk [vmem:[#allocation2 + $0x2b] sm:$0x3f] %vm238_vm8, %v2638_v11  ;;  %v472_v59 = vld [vmem:[#allocation2 + $0x11] sm:$0xff]  ;;  %2348 = vmatprep.subr.bf16.mxu1 %v2641_v1 }
 0x2c4   :  { %460 = vst.msk [vmem:[#allocation2 + $0x21] sm:$0xff] %vm12_vm3, %v454_v57  ;;  %492 = vrot.lane.b32.xlu0 %v472_v59, %s2640_s21  ;;  %v478_v6 = vld [vmem:[#allocation2 + $0x12] sm:$0xff]  ;;  %v739_v57 = vld [vmem:[%s3730_s1 + $0x200] sm:$0xff] }
 0x2c5   :  { %v466_v8 = vld [vmem:[#allocation2 + $0x10] sm:$0xff]  ;;  %v467_v13 = vld [vmem:[#allocation2 + $0x18] sm:$0xff]  ;;  %v2367_v58 = vpack.c.bf16 %v739_v57, %v738_v56  ;;  %v1917_v59 = vld [vmem:[%s3730_s1 + $0x140] ss:$0 sm:$0xff] }
 0x2c6   :  { %2350 = vmatpush1.bf16.msra.mxu1 %v2349_v40  ;;  %v1052_v53 = vld [vmem:[%s3730_s1 + $0x298] sm:$0xff]  ;;  %v1053_v57 = vld [vmem:[%s3730_s1 + $0x2a0] sm:$0xff] }
 0x2c7   :  { %2351 = vmatprep.subr.bf16.mxu1 %v2641_v1  ;;  %v1036_v56 = vld [vmem:[%s3730_s1 + $0x218] sm:$0xff] }
 0x2ca   :  { %v475_v60 = vld [vmem:[#allocation2 + $0x29] sm:$0xff]  ;;  %2353 = vmatpush1.bf16.msra.mxu1 %v2352_v43 }
 0x2cb   :  { %v474_v61 = vld [vmem:[#allocation2 + $0x21] sm:$0xff]  ;;  %498 = vrot.lane.b32.xlu1 %v475_v60, %s2640_s21  ;;  %v481_v20 = vld [vmem:[#allocation2 + $0x2a] sm:$0xff]  ;;  %2354 = vmatprep.subr.bf16.mxu1 %v2641_v1 }
 0x2cc   :  { %496 = vrot.lane.b32.xlu0 %v474_v61, %s2640_s21  ;;  %v479_v12 = vld [vmem:[#allocation2 + $0x1a] sm:$0xff]  ;;  %v480_v15 = vld [vmem:[#allocation2 + $0x22] sm:$0xff] }
 0x2cd   :  { %v468_v17 = vld [vmem:[#allocation2 + $0x20] sm:$0xff]  ;;  %v469_v21 = vld [vmem:[#allocation2 + $0x28] sm:$0xff] }
 0x2ce   :  { %2356 = vmatpush1.bf16.msra.mxu1 %v2355_v46 }
 0x2cf   :  { %2357 = vmatprep.subr.bf16.mxu1 %v2641_v1 }
 0x2d2   :  { %2359 = vmatpush1.bf16.msra.mxu1 %v2358_v49 }
 0x2d3   :  { %2360 = vmatprep.subr.bf16.mxu1 %v2641_v1 }
 0x2d6   :  { %2362 = vmatpush1.bf16.msra.mxu1 %v2361_v52  ;;  %v1051_v52 = vld [vmem:[%s3730_s1 + $0x290] sm:$0xff] }
 0x2d7   :  { %2363 = vmatprep.subr.bf16.mxu1 %v2641_v1 }
 0x2da   :  { %2365 = vmatpush1.bf16.msra.mxu1 %v2364_v55  ;;  %v2369_v55 = vpack.c.bf16 %v1052_v53, %v1051_v52 }
 0x2db   :  { %2366 = vmatprep.subr.bf16.mxu1 %v2641_v1 }
 0x2dc   :  { %2370 = vmatprep.subr.bf16.mxu0 %v2369_v55 }
 0x2de   :  { %2368 = vmatpush1.bf16.msra.mxu1 %v2367_v58  ;;  %v1054_v58 = vld [vmem:[%s3730_s1 + $0x2a8] sm:$0xff] }
 0x32b   :  { %v491_v2 = vpop.permute.xlu1 %490 }
 0x32c   :  { %v507_v5 = vsel %vm12_vm3, %v465_v4, %v491_v2 }
 0x32d   :  { %v489_v62 = vpop.permute.xlu0 %488 }
 0x32e   :  { %v506_v0 = vsel %vm12_vm3, %v464_v63, %v489_v62 }
 0x32f   :  { %624 = vmatmul.mubr.f32.vlgmr.msra.gmra.mrb[6].mxu0 %v506_v0 }
 0x330   :  { %1919 = vmatprep.mubr.msk.f32.mxu0 %vm12_vm3, %v477_v3 }
 0x333   :  { %629 = vmatmul.mubr.f32.gmra.mrb[8].mxu0 %v507_v5 }
 0x334   :  { %1920 = vmatprep.mubr.msk.f32.mxu0 %vm12_vm3, %v478_v6  ;;  %v495_v10 = vpop.permute.xlu1 %494 }
 0x335   :  { %v509_v14 = vsel %vm12_vm3, %v467_v13, %v495_v10 }
 0x336   :  { %v493_v7 = vpop.permute.xlu0 %492 }
 0x337   :  { %v508_v9 = vsel %vm12_vm3, %v466_v8, %v493_v7 }
 0x338   :  { %634 = vmatmul.mubr.f32.gmra.mrb[10].mxu0 %v508_v9 }
 0x339   :  { %1921 = vmatprep.mubr.msk.f32.mxu0 %vm12_vm3, %v479_v12 }
 0x33c   :  { %639 = vmatmul.mubr.f32.gmra.mrb[12].mxu0 %v509_v14 }
 0x33d   :  { %1922 = vmatprep.mubr.msk.f32.mxu0 %vm12_vm3, %v480_v15  ;;  %v499_v19 = vpop.permute.xlu1 %498 }
 0x33e   :  { %v497_v16 = vpop.permute.xlu0 %496  ;;  %v511_v22 = vsel %vm12_vm3, %v469_v21, %v499_v19 }
 0x33f   :  { %v510_v18 = vsel %vm12_vm3, %v468_v17, %v497_v16 }
 0x340   :  { %644 = vmatmul.mubr.f32.gmra.mrb[14].mxu0 %v510_v18 }
 0x341   :  { %1923 = vmatprep.mubr.msk.f32.mxu0 %vm12_vm3, %v481_v20 }
 0x344   :  { %649 = vmatmul.mubr.f32.gmra.mrb[16].mxu0 %v511_v22 }
 0x402   :  { %v625_v60 = vpop.f32.mrb[6].mxu0 }
 0x403   :  { %v626_v61 = vadd.f32 %v1917_v59, %v625_v60  ;;  %v627_v62 = vpop.f32.mrb[7].mxu0  ;;  %v2373_v60 = vpack.c.bf16 %v1054_v58, %v1053_v57  ;;  %v1062_v57 = vld [vmem:[%s3730_s1 + $0x2e8] sm:$0xff]  ;;  %v1091_v58 = vld [vmem:[%s3730_s1 + $0x3d0] sm:$0xff] }
 0x404   :  { %v1084_v62 = vld [vmem:[%s3730_s1 + $0x398] sm:$0xff] }
 0x405   :  { %v654_v63 = vmax.f32 %v626_v61, 0.0  ;;  %v1083_v61 = vld [vmem:[%s3730_s1 + $0x390] sm:$0xff] }
 0x406   :  { %v630_v0 = vpop.f32.mrb[8].mxu0 }
 0x407   :  { %660 = vst.msk [vmem:[#allocation2 + $0x1] sm:$0xff] %vm12_vm3, %v654_v63  ;;  %v631_v2 = vadd.f32 %v1917_v59, %v630_v0  ;;  %v632_v3 = vpop.f32.mrb[9].mxu0  ;;  %v1037_v63 = vld [vmem:[%s3730_s1 + $0x220] sm:$0xff]  ;;  %v2401_v0 = vpack.c.bf16 %v1084_v62, %v1083_v61  ;;  %v1092_v61 = vld [vmem:[%s3730_s1 + $0x3d8] sm:$0xff] }
 0x408   :  { %v1067_v3 = vld [vmem:[%s3730_s1 + $0x310] sm:$0xff]  ;;  %v1045_v62 = vld [vmem:[%s3730_s1 + $0x260] sm:$0xff] }
 0x409   :  { %v655_v4 = vmax.f32 %v631_v2, 0.0  ;;  %v1038_v2 = vld [vmem:[%s3730_s1 + $0x228] sm:$0xff]  ;;  %2402 = vmatprep.subr.bf16.mxu1 %v2401_v0 }
 0x40b   :  { %661 = vst.msk [vmem:[#allocation2 + $0x9] sm:$0xff] %vm12_vm3, %v655_v4  ;;  %v635_v5 = vpop.f32.mrb[10].mxu0  ;;  %v1068_v4 = vld [vmem:[%s3730_s1 + $0x318] sm:$0xff] }
 0x40c   :  { %v636_v6 = vadd.f32 %v1917_v59, %v635_v5  ;;  %v637_v7 = vpop.f32.mrb[11].mxu0  ;;  %v2375_v5 = vpack.c.bf16 %v1038_v2, %v1037_v63 }
 0x40d   :  { %v1055_v7 = vld [vmem:[%s3730_s1 + $0x2b0] sm:$0xff] }
 0x40e   :  { %v656_v8 = vmax.f32 %v636_v6, 0.0  ;;  %v674_v9 = vld [vmem:[#allocation2 + $0x1] sm:$0xff]  ;;  %v2403_v6 = vpack.c.bf16 %v1068_v4, %v1067_v3  ;;  %v1075_v4 = vld [vmem:[%s3730_s1 + $0x350] sm:$0xff] }
 0x40f   :  { %v640_v10 = vpop.f32.mrb[12].mxu0  ;;  %692 = vrot.lane.b32.xlu0 %v674_v9, %s2640_s21  ;;  %v668_v30 = vld [vmem:[#allocation2] sm:$0xff]  ;;  %v1046_v3 = vld [vmem:[%s3730_s1 + $0x268] sm:$0xff] }
 0x410   :  { %662 = vst.msk [vmem:[#allocation2 + $0x11] sm:$0xff] %vm12_vm3, %v656_v8  ;;  %v641_v12 = vadd.f32 %v1917_v59, %v640_v10  ;;  %v642_v13 = vpop.f32.mrb[13].mxu0  ;;  %v1056_v8 = vld [vmem:[%s3730_s1 + $0x2b8] sm:$0xff]  ;;  %v1085_v9 = vld [vmem:[%s3730_s1 + $0x3a0] sm:$0xff] }
 0x411   :  { %666 = vst.msk [vmem:[#allocation2 + $0x13] sm:$0x3f] %vm238_vm8, %v2638_v11  ;;  %v2377_v10 = vpack.c.bf16 %v1056_v8, %v1055_v7  ;;  %v1039_v13 = vld [vmem:[%s3730_s1 + $0x230] sm:$0xff]  ;;  %v2417_v8 = vpack.c.bf16 %v1092_v61, %v1091_v58  ;;  %v1081_v61 = vld [vmem:[%s3730_s1 + $0x380] sm:$0xff] }
 0x412   :  { %v657_v14 = vmax.f32 %v641_v12, 0.0  ;;  %v675_v15 = vld [vmem:[#allocation2 + $0x9] sm:$0xff] }
 0x413   :  { %v680_v16 = vld [vmem:[#allocation2 + $0x2] sm:$0xff]  ;;  %v645_v17 = vpop.f32.mrb[14].mxu0  ;;  %694 = vrot.lane.b32.xlu1 %v675_v15, %s2640_s21  ;;  %v1115_v58 = vld [vmem:[%s3730_s1 + $0x490] sm:$0xff] }
 0x414   :  { %1925 = vmatprep.mubr.msk.f32.mxu1 %vm12_vm3, %v680_v16  ;;  %663 = vst.msk [vmem:[#allocation2 + $0x19] sm:$0xff] %vm12_vm3, %v657_v14  ;;  %v646_v18 = vadd.f32 %v1917_v59, %v645_v17  ;;  %v647_v19 = vpop.f32.mrb[15].mxu0  ;;  %v669_v34 = vld [vmem:[#allocation2 + $0x8] sm:$0xff]  ;;  %v1040_v14 = vld [vmem:[%s3730_s1 + $0x238] sm:$0xff]  ;;  %v1069_v16 = vld [vmem:[%s3730_s1 + $0x320] sm:$0xff] }
 0x415   :  { %v1086_v12 = vld [vmem:[%s3730_s1 + $0x3a8] sm:$0xff]  ;;  %v2379_v19 = vpack.c.bf16 %v1040_v14, %v1039_v13 }
 0x416   :  { %v658_v20 = vmax.f32 %v646_v18, 0.0  ;;  %v2405_v15 = vpack.c.bf16 %v1086_v12, %v1085_v9  ;;  %v1070_v17 = vld [vmem:[%s3730_s1 + $0x328] sm:$0xff]  ;;  %v2391_v9 = vpack.c.bf16 %v1046_v3, %v1045_v62 }
 0x417   :  { %v650_v21 = vpop.f32.mrb[16].mxu0  ;;  %v681_v32 = vld [vmem:[#allocation2 + $0xa] sm:$0xff]  ;;  %v2407_v18 = vpack.c.bf16 %v1070_v17, %v1069_v16  ;;  %v1064_v17 = vld [vmem:[%s3730_s1 + $0x2f8] sm:$0xff] }
 0x418   :  { %664 = vst.msk [vmem:[#allocation2 + $0x21] sm:$0xff] %vm12_vm3, %v658_v20  ;;  %v651_v22 = vadd.f32 %v1917_v59, %v650_v21  ;;  %v652_v23 = vpop.f32.mrb[17].mxu0  ;;  %v676_v24 = vld [vmem:[#allocation2 + $0x11] sm:$0xff]  ;;  %v2371_v59 = vpack.c.bf16 %v1036_v56, %v1035_v54  ;;  %v3136_v20 = vld [vmem:[%s3730_s1 + $0x208] ss:$0 sm:$0xff]  ;;  %v1061_v56 = vld [vmem:[%s3730_s1 + $0x2e0] sm:$0xff] }
 0x419   :  { %696 = vrot.lane.b32.xlu0 %v676_v24, %s2640_s21  ;;  %v670_v38 = vld [vmem:[#allocation2 + $0x10] sm:$0xff]  ;;  %v1082_v62 = vld [vmem:[%s3730_s1 + $0x388] sm:$0xff] }
 0x41a   :  { %v659_v25 = vmax.f32 %v651_v22, 0.0  ;;  %2372 = vmatpush3.bf16.msra.mxu0 %v2371_v59  ;;  %v1063_v16 = vld [vmem:[%s3730_s1 + $0x2f0] sm:$0xff] }
 0x41b   :  { %v677_v26 = vld [vmem:[#allocation2 + $0x19] sm:$0xff]  ;;  %2374 = vmatprep.subr.bf16.mxu0 %v2373_v60  ;;  %v2389_v60 = vpack.c.bf16 %v1062_v57, %v1061_v56  ;;  %v1098_v57 = vld [vmem:[%s3730_s1 + $0x408] sm:$0xff] }
 0x41c   :  { %665 = vst.msk [vmem:[#allocation2 + $0x29] sm:$0xff] %vm12_vm3, %v659_v25  ;;  %698 = vrot.lane.b32.xlu1 %v677_v26, %s2640_s21  ;;  %v682_v36 = vld [vmem:[#allocation2 + $0x12] sm:$0xff]  ;;  %v1057_v25 = vld [vmem:[%s3730_s1 + $0x2c0] sm:$0xff]  ;;  %v1058_v26 = vld [vmem:[%s3730_s1 + $0x2c8] sm:$0xff] }
 0x41d   :  { %667 = vst.msk [vmem:[#allocation2 + $0x2b] sm:$0x3f] %vm238_vm8, %v2638_v11  ;;  %v671_v42 = vld [vmem:[#allocation2 + $0x18] sm:$0xff]  ;;  %v1097_v56 = vld [vmem:[%s3730_s1 + $0x400] sm:$0xff] }
 0x41e   :  { %2376 = vmatpush3.bf16.msra.mxu0 %v2375_v5 }
 0x41f   :  { %v678_v27 = vld [vmem:[#allocation2 + $0x21] sm:$0xff]  ;;  %2378 = vmatprep.subr.bf16.mxu0 %v2377_v10  ;;  %v1076_v10 = vld [vmem:[%s3730_s1 + $0x358] sm:$0xff] }
 0x420   :  { %700 = vrot.lane.b32.xlu0 %v678_v27, %s2640_s21  ;;  %v683_v40 = vld [vmem:[#allocation2 + $0x1a] sm:$0xff]  ;;  %v1087_v27 = vld [vmem:[%s3730_s1 + $0x3b0] sm:$0xff] }
 0x421   :  { %v672_v46 = vld [vmem:[#allocation2 + $0x20] sm:$0xff] }
 0x422   :  { %2380 = vmatpush3.bf16.msra.mxu0 %v2379_v19 }
 0x423   :  { %v684_v44 = vld [vmem:[#allocation2 + $0x22] sm:$0xff] }
 0x424   :  { %v679_v28 = vld [vmem:[#allocation2 + $0x29] sm:$0xff] }
 0x425   :  { %702 = vrot.lane.b32.xlu1 %v679_v28, %s2640_s21  ;;  %v685_v48 = vld [vmem:[#allocation2 + $0x2a] sm:$0xff] }
 0x426   :  { %v673_v50 = vld [vmem:[#allocation2 + $0x28] sm:$0xff] }
 0x481   :  { %v693_v29 = vpop.permute.xlu0 %692 }
 0x482   :  { %v710_v31 = vsel %vm12_vm3, %v668_v30, %v693_v29  ;;  %v2381_v29 = vpack.c.bf16 %v1058_v26, %v1057_v25  ;;  %v1088_v30 = vld [vmem:[%s3730_s1 + $0x3b8] sm:$0xff]  ;;  %v1077_v26 = vld [vmem:[%s3730_s1 + $0x360] sm:$0xff] }
 0x483   :  { %828 = vmatmul.mubr.f32.vlgmr.msra.gmra.mrb[6].mxu1 %v710_v31  ;;  %v1041_v31 = vld [vmem:[%s3730_s1 + $0x240] sm:$0xff]  ;;  %v1048_v25 = vld [vmem:[%s3730_s1 + $0x278] sm:$0xff] }
 0x484   :  { %1926 = vmatprep.mubr.msk.f32.mxu1 %vm12_vm3, %v681_v32  ;;  %2404 = vmatpush3.bf16.msra.mxu1 %v2403_v6  ;;  %v1042_v32 = vld [vmem:[%s3730_s1 + $0x248] sm:$0xff] }
 0x485   :  { %v695_v33 = vpop.permute.xlu1 %694  ;;  %2406 = vmatprep.subr.bf16.mxu1 %v2405_v15  ;;  %2382 = vmatprep.subr.bf16.mxu0 %v2381_v29  ;;  %v2419_v15 = vpack.c.bf16 %v1076_v10, %v1075_v4 }
 0x486   :  { %v711_v35 = vsel %vm12_vm3, %v669_v34, %v695_v33 }
 0x487   :  { %833 = vmatmul.mubr.f32.gmra.mrb[8].mxu1 %v711_v35  ;;  %v2409_v35 = vpack.c.bf16 %v1088_v30, %v1087_v27 }
 0x488   :  { %1927 = vmatprep.mubr.msk.f32.mxu1 %vm12_vm3, %v682_v36  ;;  %2408 = vmatpush3.bf16.msra.mxu1 %v2407_v18  ;;  %v2383_v36 = vpack.c.bf16 %v1042_v32, %v1041_v31  ;;  %v1093_v18 = vld [vmem:[%s3730_s1 + $0x3e0] sm:$0xff]  ;;  %v1078_v31 = vld [vmem:[%s3730_s1 + $0x368] sm:$0xff] }
 0x489   :  { %2410 = vmatprep.subr.bf16.mxu1 %v2409_v35 }
 0x48a   :  { %2384 = vmatpush3.bf16.msra.mxu0 %v2383_v36  ;;  %v2423_v36 = vpack.c.bf16 %v1078_v31, %v1077_v26  ;;  %v1100_v31 = vld [vmem:[%s3730_s1 + $0x418] sm:$0xff] }
 0x48b   :  { %v697_v37 = vpop.permute.xlu0 %696 }
 0x48c   :  { %v712_v39 = vsel %vm12_vm3, %v670_v38, %v697_v37  ;;  %v1071_v37 = vld [vmem:[%s3730_s1 + $0x330] sm:$0xff]  ;;  %v1072_v38 = vld [vmem:[%s3730_s1 + $0x338] sm:$0xff] }
 0x48d   :  { %838 = vmatmul.mubr.f32.gmra.mrb[10].mxu1 %v712_v39  ;;  %v2411_v39 = vpack.c.bf16 %v1072_v38, %v1071_v37  ;;  %v1065_v37 = vld [vmem:[%s3730_s1 + $0x300] sm:$0xff]  ;;  %v1066_v38 = vld [vmem:[%s3730_s1 + $0x308] sm:$0xff] }
 0x48e   :  { %v699_v41 = vpop.permute.xlu1 %698  ;;  %1928 = vmatprep.mubr.msk.f32.mxu1 %vm12_vm3, %v683_v40 }
 0x48f   :  { %v713_v43 = vsel %vm12_vm3, %v671_v42, %v699_v41  ;;  %v1059_v41 = vld [vmem:[%s3730_s1 + $0x2d0] sm:$0xff]  ;;  %v1060_v42 = vld [vmem:[%s3730_s1 + $0x2d8] sm:$0xff]  ;;  %2412 = vmatpush3.bf16.msra.mxu1 %v2411_v39 }
 0x490   :  { %v1095_v39 = vld [vmem:[%s3730_s1 + $0x3f0] sm:$0xff] }
 0x491   :  { %843 = vmatmul.mubr.f32.gmra.mrb[12].mxu1 %v713_v43  ;;  %v1089_v43 = vld [vmem:[%s3730_s1 + $0x3c0] sm:$0xff] }
 0x492   :  { %v701_v45 = vpop.permute.xlu0 %700  ;;  %1929 = vmatprep.mubr.msk.f32.mxu1 %vm12_vm3, %v684_v44  ;;  %v2385_v44 = vpack.c.bf16 %v1060_v42, %v1059_v41  ;;  %v1096_v41 = vld [vmem:[%s3730_s1 + $0x3f8] sm:$0xff]  ;;  %v1049_v42 = vld [vmem:[%s3730_s1 + $0x280] sm:$0xff] }
 0x493   :  { %v714_v47 = vsel %vm12_vm3, %v672_v46, %v701_v45  ;;  %v1090_v45 = vld [vmem:[%s3730_s1 + $0x3c8] sm:$0xff]  ;;  %v1043_v46 = vld [vmem:[%s3730_s1 + $0x250] sm:$0xff] }
 0x494   :  { %2386 = vmatprep.subr.bf16.mxu0 %v2385_v44 }
 0x495   :  { %848 = vmatmul.mubr.f32.gmra.mrb[14].mxu1 %v714_v47  ;;  %v1044_v47 = vld [vmem:[%s3730_s1 + $0x258] sm:$0xff] }
 0x496   :  { %1930 = vmatprep.mubr.msk.f32.mxu1 %vm12_vm3, %v685_v48  ;;  %v2413_v48 = vpack.c.bf16 %v1090_v45, %v1089_v43  ;;  %v1050_v43 = vld [vmem:[%s3730_s1 + $0x288] sm:$0xff]  ;;  %v2425_v45 = vpack.c.bf16 %v1096_v41, %v1095_v39 }
 0x497   :  { %v703_v49 = vpop.permute.xlu1 %702 }
 0x498   :  { %v715_v51 = vsel %vm12_vm3, %v673_v50, %v703_v49  ;;  %v2387_v49 = vpack.c.bf16 %v1044_v47, %v1043_v46  ;;  %v1073_v50 = vld [vmem:[%s3730_s1 + $0x340] sm:$0xff]  ;;  %2414 = vmatprep.subr.bf16.mxu1 %v2413_v48  ;;  %v2399_v46 = vpack.c.bf16 %v1050_v43, %v1049_v42  ;;  %v1079_v47 = vld [vmem:[%s3730_s1 + $0x370] sm:$0xff]  ;;  %v1080_v48 = vld [vmem:[%s3730_s1 + $0x378] sm:$0xff] }
 0x499   :  { %853 = vmatmul.mubr.f32.gmra.mrb[16].mxu1 %v715_v51  ;;  %v1074_v51 = vld [vmem:[%s3730_s1 + $0x348] sm:$0xff] }
 0x49a   :  { %v2415_v53 = vpack.c.bf16 %v1074_v51, %v1073_v50  ;;  %2388 = vmatpush3.bf16.msra.mxu0 %v2387_v49  ;;  %v2427_v50 = vpack.c.bf16 %v1080_v48, %v1079_v47 }
 0x49b   :  { %2390 = vmatprep.subr.bf16.mxu0 %v2389_v60  ;;  %v1116_v60 = vld [vmem:[%s3730_s1 + $0x498] sm:$0xff] }
 0x49c   :  { %2416 = vmatpush3.bf16.msra.mxu1 %v2415_v53 }
 0x49d   :  { %2418 = vmatprep.subr.bf16.mxu1 %v2417_v8  ;;  %v1147_v8 = vld [vmem:[%s3730_s1 + $0x590] sm:$0xff] }
 0x49e   :  { %2392 = vmatpush3.bf16.msra.mxu0 %v2391_v9 }
 0x4a0   :  { %2420 = vmatpush3.bf16.msra.mxu1 %v2419_v15 }
 0x556   :  { %v829_v21 = vpop.f32.mrb[6].mxu1 }
 0x557   :  { %v830_v22 = vadd.f32 %v3136_v20, %v829_v21  ;;  %v831_v23 = vpop.f32.mrb[7].mxu1  ;;  %v2393_v21 = vpack.c.bf16 %v1064_v17, %v1063_v16 }
 0x558   :  { %v1047_v23 = vld [vmem:[%s3730_s1 + $0x270] sm:$0xff] }
 0x559   :  { %v858_v24 = vmax.f32 %v830_v22, 0.0  ;;  %v1094_v22 = vld [vmem:[%s3730_s1 + $0x3e8] sm:$0xff]  ;;  %2394 = vmatprep.subr.bf16.mxu0 %v2393_v21  ;;  %v2395_v30 = vpack.c.bf16 %v1048_v25, %v1047_v23 }
 0x55a   :  { %v834_v28 = vpop.f32.mrb[8].mxu1  ;;  %v2421_v29 = vpack.c.bf16 %v1094_v22, %v1093_v18 }
 0x55b   :  { %864 = vst.msk [vmem:[#allocation2 + $0x1] sm:$0xff] %vm12_vm3, %v858_v24  ;;  %v835_v33 = vadd.f32 %v3136_v20, %v834_v28  ;;  %v836_v34 = vpop.f32.mrb[9].mxu1  ;;  %2396 = vmatpush3.bf16.msra.mxu0 %v2395_v30  ;;  %v1099_v30 = vld [vmem:[%s3730_s1 + $0x410] sm:$0xff] }
 0x55c   :  { %2422 = vmatprep.subr.bf16.mxu1 %v2421_v29  ;;  %v2435_v39 = vpack.c.bf16 %v1100_v31, %v1099_v30  ;;  %v1133_v30 = vld [vmem:[%s3730_s1 + $0x520] sm:$0xff]  ;;  %v1134_v31 = vld [vmem:[%s3730_s1 + $0x528] sm:$0xff] }
 0x55d   :  { %v859_v40 = vmax.f32 %v835_v33, 0.0  ;;  %2424 = vmatpush3.bf16.msra.mxu1 %v2423_v36 }
 0x55e   :  { %2426 = vmatprep.subr.bf16.mxu1 %v2425_v45  ;;  %v1118_v45 = vld [vmem:[%s3730_s1 + $0x4a8] sm:$0xff] }
 0x55f   :  { %865 = vst.msk [vmem:[#allocation2 + $0x9] sm:$0xff] %vm12_vm3, %v859_v40  ;;  %v2397_v40 = vpack.c.bf16 %v1066_v38, %v1065_v37 }
 0x560   :  { %v839_v52 = vpop.f32.mrb[10].mxu1 }
 0x561   :  { %v840_v54 = vadd.f32 %v3136_v20, %v839_v52  ;;  %v841_v55 = vpop.f32.mrb[11].mxu1  ;;  %2398 = vmatprep.subr.bf16.mxu0 %v2397_v40  ;;  %2428 = vmatpush3.bf16.msra.mxu1 %v2427_v50 }
 0x562   :  { %v3200_v59 = vld [vmem:[#allocation2 + $0x1] sm:$0xff]  ;;  %2400 = vmatpush3.bf16.msra.mxu0 %v2399_v46 }
 0x563   :  { %v860_v63 = vmax.f32 %v840_v54, 0.0  ;;  %v876_v0 = vrot.slane %v3200_v59, 1  ;;  %v882_v2 = vrot.slane %v3200_v59, 3  ;;  %v888_v6 = vrot.slane %v3200_v59, 5 }
 0x564   :  { %v844_v5 = vpop.f32.mrb[12].mxu1  ;;  %v894_v7 = vrot.slane %v3200_v59, 7  ;;  %v880_v38 = vrot.slane %v3200_v59, 2 }
 0x565   :  { %866 = vst.msk [vmem:[#allocation2 + $0x11] sm:$0xff] %vm12_vm3, %v860_v63  ;;  %v845_v12 = vadd.f32 %v3136_v20, %v844_v5  ;;  %v846_v13 = vpop.f32.mrb[13].mxu1  ;;  %v2560_v14 = vpack.i.bf16 %v876_v0, %v882_v2  ;;  %v2433_v0 = vpack.c.bf16 %v1116_v60, %v1115_v58  ;;  %v2431_v2 = vpack.c.bf16 %v1082_v62, %v1081_v61  ;;  %v1131_v58 = vld [vmem:[%s3730_s1 + $0x510] sm:$0xff] }
 0x566   :  { %870 = vst.msk [vmem:[#allocation2 + $0x13] sm:$0x3f] %vm238_vm8, %v2638_v11  ;;  %v3234_v19 = vld [vmem:[#allocation2 + $0x9] sm:$0xff]  ;;  %v2570_v28 = vpack.i.bf16 %v888_v6, %v894_v7  ;;  %v1148_v13 = vld [vmem:[%s3730_s1 + $0x598] sm:$0xff]  ;;  %v886_v60 = vrot.slane %v3200_v59, 4 }
 0x567   :  { %v861_v24 = vmax.f32 %v845_v12, 0.0  ;;  %2561 = vrot.lane.b32.xlu1 %v2560_v14, %s2640_s21  ;;  %v899_v34 = vrot.slane %v3234_v19, 1  ;;  %v905_v35 = vrot.slane %v3234_v19, 3  ;;  %v911_v54 = vrot.slane %v3234_v19, 5  ;;  %2434 = vmatprep.subr.bf16.mxu0 %v2433_v0  ;;  %v1119_v0 = vld [vmem:[%s3730_s1 + $0x4b0] sm:$0xff] }
 0x568   :  { %v849_v27 = vpop.f32.mrb[14].mxu1  ;;  %v917_v55 = vrot.slane %v3234_v19, 7  ;;  %v2465_v15 = vpack.c.bf16 %v1148_v13, %v1147_v8  ;;  %v1149_v8 = vld [vmem:[%s3730_s1 + $0x5a0] sm:$0xff] }
 0x569   :  { %867 = vst.msk [vmem:[#allocation2 + $0x19] sm:$0xff] %vm12_vm3, %v861_v24  ;;  %v850_v32 = vadd.f32 %v3136_v20, %v849_v27  ;;  %v851_v33 = vpop.f32.mrb[15].mxu1  ;;  %v2580_v53 = vpack.i.bf16 %v899_v34, %v905_v35 }
 0x56a   :  { %v2590_v4 = vpack.i.bf16 %v911_v54, %v917_v55 }
 0x56b   :  { %v862_v44 = vmax.f32 %v850_v32, 0.0  ;;  %2571 = vrot.lane.b32.xlu1 %v2570_v28, %s2640_s21 }
 0x56c   :  { %v854_v49 = vpop.f32.mrb[16].mxu1  ;;  %v3311_v7 = vld [vmem:[#allocation2 + $0x11] sm:$0x3] }
 0x56d   :  { %868 = vst.msk [vmem:[#allocation2 + $0x21] sm:$0xff] %vm12_vm3, %v862_v44  ;;  %v855_v51 = vadd.f32 %v3136_v20, %v854_v49  ;;  %v856_v52 = vpop.f32.mrb[17].mxu1  ;;  %v2429_v20 = vpack.c.bf16 %v1098_v57, %v1097_v56  ;;  %v930_v16 = vrot.slane %v3311_v7, 1  ;;  %v1117_v44 = vld [vmem:[%s3730_s1 + $0x4a0] sm:$0xff] }
 0x56e   :  { %v1101_v52 = vld [vmem:[%s3730_s1 + $0x420] sm:$0xff] }
 0x56f   :  { %v863_v63 = vmax.f32 %v855_v51, 0.0  ;;  %2581 = vrot.lane.b32.xlu1 %v2580_v53, %s2640_s21  ;;  %2430 = vmatprep.subr.bf16.mxu1 %v2429_v20  ;;  %v1102_v53 = vld [vmem:[%s3730_s1 + $0x428] sm:$0xff]  ;;  %v1132_v20 = vld [vmem:[%s3730_s1 + $0x518] sm:$0xff] }
 0x570   :  { %v3304_v3 = vld [vmem:[#allocation2 + $0x19] sm:$0xff]  ;;  %2432 = vmatpush3.bf16.msra.mxu1 %v2431_v2 }
 0x571   :  { %869 = vst.msk [vmem:[#allocation2 + $0x29] sm:$0xff] %vm12_vm3, %v863_v63  ;;  %v939_v5 = vrot.slane %v3304_v3, 1  ;;  %v945_v6 = vrot.slane %v3304_v3, 3  ;;  %v951_v10 = vrot.slane %v3304_v3, 5  ;;  %v957_v12 = vrot.slane %v3304_v3, 7  ;;  %2466 = vmatprep.subr.bf16.mxu1 %v2465_v15 }
 0x572   :  { %871 = vst.msk [vmem:[#allocation2 + $0x2b] sm:$0x3f] %vm238_vm8, %v2638_v11  ;;  %v943_v35 = vrot.slane %v3304_v3, 2  ;;  %v949_v42 = vrot.slane %v3304_v3, 4  ;;  %v955_v43 = vrot.slane %v3304_v3, 6  ;;  %v2437_v63 = vpack.c.bf16 %v1118_v45, %v1117_v44 }
 0x573   :  { %2591 = vrot.lane.b32.xlu1 %v2590_v4, %s2640_s21  ;;  %v2555_v9 = vpack.i.bf16 %v939_v5, %v945_v6  ;;  %v2565_v17 = vpack.i.bf16 %v951_v10, %v957_v12  ;;  %v892_v4 = vrot.slane %v3200_v59, 6  ;;  %v2439_v5 = vpack.c.bf16 %v1102_v53, %v1101_v52  ;;  %v1120_v6 = vld [vmem:[%s3730_s1 + $0x4b8] sm:$0xff]  ;;  %v1135_v52 = vld [vmem:[%s3730_s1 + $0x530] sm:$0xff] }
 0x574   :  { %v3322_v14 = vld [vmem:[#allocation2 + $0x21] sm:$0xff]  ;;  %v2467_v15 = vpack.c.bf16 %v1132_v20, %v1131_v58  ;;  %v2471_v45 = vpack.c.bf16 %v1134_v31, %v1133_v30  ;;  %v1136_v53 = vld [vmem:[%s3730_s1 + $0x538] sm:$0xff] }
 0x575   :  { %2556 = vrot.lane.b32.xlu0 %v2555_v9, %s2640_s21  ;;  %v962_v18 = vrot.slane %v3322_v14, 1  ;;  %v968_v21 = vrot.slane %v3322_v14, 3  ;;  %v974_v23 = vrot.slane %v3322_v14, 5  ;;  %v980_v24 = vrot.slane %v3322_v14, 7  ;;  %v1150_v9 = vld [vmem:[%s3730_s1 + $0x5a8] sm:$0xff]  ;;  %v1153_v58 = vld [vmem:[%s3730_s1 + $0x5c0] sm:$0xff] }
 0x576   :  { %v966_v12 = vrot.slane %v3322_v14, 2  ;;  %v1154_v20 = vld [vmem:[%s3730_s1 + $0x5c8] sm:$0xff] }
 0x577   :  { %931 = vrot.lane.b32.xlu1 %v930_v16, %s2640_s21  ;;  %v2575_v22 = vpack.i.bf16 %v962_v18, %v968_v21  ;;  %v2585_v25 = vpack.i.bf16 %v974_v23, %v980_v24  ;;  %v1104_v23 = vld [vmem:[%s3730_s1 + $0x438] sm:$0xff]  ;;  %v1158_v30 = vld [vmem:[%s3730_s1 + $0x5e8] sm:$0xff] }
 0x578   :  { %v3333_v26 = vld [vmem:[#allocation2 + $0x29] sm:$0x3] }
 0x579   :  { %2566 = vrot.lane.b32.xlu0 %v2565_v17, %s2640_s21  ;;  %v993_v27 = vrot.slane %v3333_v26, 1 }
 0x57d   :  { %2576 = vrot.lane.b32.xlu0 %v2575_v22, %s2640_s21  ;;  %v1103_v22 = vld [vmem:[%s3730_s1 + $0x430] sm:$0xff] }
 0x581   :  { %2586 = vrot.lane.b32.xlu0 %v2585_v25, %s2640_s21 }
 0x585   :  { %994 = vrot.lane.b32.xlu0 %v993_v27, %s2640_s21 }
 0x5d9   :  { %v2562_v28 = vpop.permute.xlu1 %2561 }
 0x5da   :  { %v2564_v32 = vunpack.i.h.bf16 %v2562_v28  ;;  %v2563_v33 = vunpack.i.l.bf16 %v2562_v28  ;;  %v2441_v28 = vpack.c.bf16 %v1120_v6, %v1119_v0  ;;  %v1107_v0 = vld [vmem:[%s3730_s1 + $0x450] sm:$0xff]  ;;  %v1137_v6 = vld [vmem:[%s3730_s1 + $0x540] sm:$0xff] }
 0x5dc   :  { %v921_v46 = vsel %vm12_vm3, %v3200_v59, %v2564_v32  ;;  %v922_v50 = vsel %vm12_vm3, %v880_v38, %v2563_v33  ;;  %v1121_v32 = vld [vmem:[%s3730_s1 + $0x4c0] sm:$0xff]  ;;  %v978_v38 = vrot.slane %v3322_v14, 6 }
 0x5dd   :  { %v2572_v29 = vpop.permute.xlu1 %2571 }
 0x5de   :  { %v2574_v54 = vunpack.i.h.bf16 %v2572_v29  ;;  %v2573_v55 = vunpack.i.l.bf16 %v2572_v29  ;;  %v2469_v29 = vpack.c.bf16 %v1150_v9, %v1149_v8  ;;  %v1138_v8 = vld [vmem:[%s3730_s1 + $0x548] sm:$0xff]  ;;  %v1125_v9 = vld [vmem:[%s3730_s1 + $0x4e0] sm:$0xff] }
 0x5e0   :  { %v923_v16 = vsel %vm12_vm3, %v886_v60, %v2574_v54  ;;  %v924_v21 = vsel %vm12_vm3, %v892_v4, %v2573_v55  ;;  %v1123_v54 = vld [vmem:[%s3730_s1 + $0x4d0] sm:$0xff] }
 0x5e1   :  { %v3359_v47 = vpop.permute.xlu1 %2581 }
 0x5e2   :  { %v2583_v17 = vunpack.i.l.bf16 %v3359_v47 }
 0x5e5   :  { %v3405_v24 = vpop.permute.xlu1 %2591 }
 0x5e7   :  { %v2557_v34 = vpop.permute.xlu0 %2556 }
 0x5e8   :  { %v2559_v36 = vunpack.i.h.bf16 %v2557_v34  ;;  %v2558_v37 = vunpack.i.l.bf16 %v2557_v34  ;;  %v903_v34 = vrot.slane %v3234_v19, 2 }
 0x5ea   :  { %v984_v40 = vsel %vm12_vm3, %v3304_v3, %v2559_v36  ;;  %v985_v41 = vsel %vm12_vm3, %v943_v35, %v2558_v37  ;;  %v1122_v35 = vld [vmem:[%s3730_s1 + $0x4c8] sm:$0xff]  ;;  %v1151_v36 = vld [vmem:[%s3730_s1 + $0x5b0] sm:$0xff]  ;;  %v1152_v37 = vld [vmem:[%s3730_s1 + $0x5b8] sm:$0xff]  ;;  %v926_v44 = vsel %vm12_vm3, %v903_v34, %v2583_v17 }
 0x5eb   :  { %v1007_v48 = vrot.slane %v984_v40, 7  ;;  %v2567_v49 = vpop.permute.xlu0 %2566  ;;  %v1008_v51 = vrot.slane %v985_v41, 7  ;;  %v2443_v41 = vpack.c.bf16 %v1104_v23, %v1103_v22  ;;  %v1109_v17 = vld [vmem:[%s3730_s1 + $0x460] sm:$0xff]  ;;  %v1139_v23 = vld [vmem:[%s3730_s1 + $0x550] sm:$0xff]  ;;  %v1112_v34 = vld [vmem:[%s3730_s1 + $0x478] sm:$0xff] }
 0x5ec   :  { %v2569_v56 = vunpack.i.h.bf16 %v2567_v49  ;;  %v2568_v57 = vunpack.i.l.bf16 %v2567_v49 }
 0x5ed   :  { %v1027_v61 = vsel %vm1025_vm10, %v922_v50, %v1008_v51  ;;  %v1026_v62 = vsel %vm1025_vm10, %v921_v46, %v1007_v48  ;;  %v1105_v46 = vld [vmem:[%s3730_s1 + $0x440] sm:$0xff]  ;;  %v1106_v48 = vld [vmem:[%s3730_s1 + $0x448] sm:$0xff]  ;;  %v2445_v50 = vpack.c.bf16 %v1122_v35, %v1121_v32  ;;  %v2473_v51 = vpack.c.bf16 %v1152_v37, %v1151_v36 }
 0x5ee   :  { %v986_v2 = vsel %vm12_vm3, %v949_v42, %v2569_v56  ;;  %v987_v3 = vsel %vm12_vm3, %v955_v43, %v2568_v57  ;;  %1248 = vmatprep.mubr.f32.mxu0 %v1027_v61  ;;  %v2593_v42 = vunpack.i.l.bf16 %v3405_v24  ;;  %v915_v56 = vrot.slane %v3234_v19, 6  ;;  %v1124_v57 = vld [vmem:[%s3730_s1 + $0x4d8] sm:$0xff]  ;;  %v1141_v37 = vld [vmem:[%s3730_s1 + $0x560] sm:$0xff] }
 0x5ef   :  { %v1009_v10 = vrot.slane %v986_v2, 7  ;;  %v3393_v13 = vpop.permute.xlu0 %2576  ;;  %1249 = vmatmul.mubr.f32.vlgmr.msra.gmra.mrb[18].mxu0 %v1026_v62  ;;  %v1010_v59 = vrot.slane %v987_v3, 7  ;;  %v2447_v62 = vpack.c.bf16 %v1106_v48, %v1105_v46  ;;  %v1108_v2 = vld [vmem:[%s3730_s1 + $0x458] sm:$0xff]  ;;  %v2449_v4 = vpack.c.bf16 %v1124_v57, %v1123_v54  ;;  %v1113_v48 = vld [vmem:[%s3730_s1 + $0x480] sm:$0xff]  ;;  %v1162_v54 = vld [vmem:[%s3730_s1 + $0x608] sm:$0xff] }
 0x5f0   :  { %v2578_v18 = vunpack.i.l.bf16 %v3393_v13  ;;  %2436 = vmatpush3.bf16.msra.mxu0 %v2435_v39  ;;  %v928_v61 = vsel %vm12_vm3, %v915_v56, %v2593_v42  ;;  %v1159_v42 = vld [vmem:[%s3730_s1 + $0x5f0] sm:$0xff] }
 0x5f1   :  { %v1029_v25 = vsel %vm1025_vm10, %v924_v21, %v1010_v59  ;;  %2438 = vmatprep.subr.bf16.mxu0 %v2437_v63  ;;  %v1028_v27 = vsel %vm1025_vm10, %v923_v16, %v1009_v10  ;;  %v2475_v63 = vpack.c.bf16 %v1136_v53, %v1135_v52  ;;  %v1126_v10 = vld [vmem:[%s3730_s1 + $0x4e8] sm:$0xff]  ;;  %v1156_v59 = vld [vmem:[%s3730_s1 + $0x5d8] sm:$0xff]  ;;  %v2479_v16 = vpack.c.bf16 %v1138_v8, %v1137_v6  ;;  %v1161_v53 = vld [vmem:[%s3730_s1 + $0x600] sm:$0xff] }
 0x5f2   :  { %v989_v33 = vsel %vm12_vm3, %v966_v12, %v2578_v18  ;;  %1318 = vmatprep.mubr.f32.mxu1 %v1029_v25  ;;  %v1155_v12 = vld [vmem:[%s3730_s1 + $0x5d0] sm:$0xff]  ;;  %v1110_v18 = vld [vmem:[%s3730_s1 + $0x468] sm:$0xff]  ;;  %v2453_v21 = vpack.c.bf16 %v1126_v10, %v1125_v9  ;;  %v1140_v25 = vld [vmem:[%s3730_s1 + $0x558] sm:$0xff] }
 0x5f3   :  { %v3430_v39 = vpop.permute.xlu0 %2586  ;;  %1319 = vmatmul.mubr.f32.vlgmr.msra.gmra.mrb[18].mxu1 %v1028_v27  ;;  %v1012_v40 = vrot.slane %v989_v33, 7  ;;  %v2481_v22 = vpack.c.bf16 %v1156_v59, %v1155_v12  ;;  %v1127_v27 = vld [vmem:[%s3730_s1 + $0x4f0] sm:$0xff]  ;;  %v2455_v31 = vpack.c.bf16 %v1110_v18, %v1109_v17  ;;  %v2483_v32 = vpack.c.bf16 %v1140_v25, %v1139_v23  ;;  %v1144_v52 = vld [vmem:[%s3730_s1 + $0x578] sm:$0xff]  ;;  %v1165_v6 = vld [vmem:[%s3730_s1 + $0x620] sm:$0xff] }
 0x5f4   :  { %v2588_v43 = vunpack.i.l.bf16 %v3430_v39  ;;  %2440 = vmatpush3.bf16.msra.mxu0 %v2439_v5  ;;  %2468 = vmatpush3.bf16.msra.mxu1 %v2467_v15  ;;  %v2477_v5 = vpack.c.bf16 %v1154_v20, %v1153_v58  ;;  %v2451_v15 = vpack.c.bf16 %v1108_v2, %v1107_v0  ;;  %v1111_v33 = vld [vmem:[%s3730_s1 + $0x470] sm:$0xff]  ;;  %v2589_v56 = vunpack.i.h.bf16 %v3430_v39  ;;  %v1145_v20 = vld [vmem:[%s3730_s1 + $0x580] sm:$0xff]  ;;  %v1164_v0 = vld [vmem:[%s3730_s1 + $0x618] sm:$0xff] }
 0x5f5   :  { %2442 = vmatprep.subr.bf16.mxu0 %v2441_v28  ;;  %v1031_v49 = vsel %vm1025_vm10, %v926_v44, %v1012_v40  ;;  %2470 = vmatprep.subr.bf16.mxu1 %v2469_v29  ;;  %v1128_v28 = vld [vmem:[%s3730_s1 + $0x4f8] sm:$0xff]  ;;  %v1157_v29 = vld [vmem:[%s3730_s1 + $0x5e0] sm:$0xff]  ;;  %v2579_v44 = vunpack.i.h.bf16 %v3393_v13  ;;  %v1143_v13 = vld [vmem:[%s3730_s1 + $0x570] sm:$0xff] }
 0x5f6   :  { %v991_v55 = vsel %vm12_vm3, %v978_v38, %v2588_v43  ;;  %1388 = vmatprep.mubr.f32.mxu0 %v1031_v49  ;;  %v2457_v35 = vpack.c.bf16 %v1128_v28, %v1127_v27  ;;  %v2485_v36 = vpack.c.bf16 %v1158_v30, %v1157_v29  ;;  %v1142_v38 = vld [vmem:[%s3730_s1 + $0x568] sm:$0xff]  ;;  %v1129_v40 = vld [vmem:[%s3730_s1 + $0x500] sm:$0xff]  ;;  %v1160_v43 = vld [vmem:[%s3730_s1 + $0x5f8] sm:$0xff]  ;;  %v2491_v58 = vpack.c.bf16 %v1144_v52, %v1143_v13 }
 0x5f7   :  { %v1014_v60 = vrot.slane %v991_v55, 7  ;;  %v2487_v46 = vpack.c.bf16 %v1142_v38, %v1141_v37  ;;  %v988_v55 = vsel %vm12_vm3, %v3322_v14, %v2579_v44  ;;  %v1163_v39 = vld [vmem:[%s3730_s1 + $0x610] sm:$0xff]  ;;  %v1166_v8 = vld [vmem:[%s3730_s1 + $0x628] sm:$0xff]  ;;  %v1169_v18 = vld [vmem:[%s3730_s1 + $0x640] sm:$0xff] }
 0x5f8   :  { %2444 = vmatpush3.bf16.msra.mxu0 %v2443_v41  ;;  %2472 = vmatpush3.bf16.msra.mxu1 %v2471_v45  ;;  %v1130_v41 = vld [vmem:[%s3730_s1 + $0x508] sm:$0xff]  ;;  %v2459_v45 = vpack.c.bf16 %v1112_v34, %v1111_v33  ;;  %v1011_v2 = vrot.slane %v988_v55, 7  ;;  %v2501_v12 = vpack.c.bf16 %v1166_v8, %v1165_v6  ;;  %v1171_v23 = vld [vmem:[%s3730_s1 + $0x650] sm:$0xff]  ;;  %v1172_v25 = vld [vmem:[%s3730_s1 + $0x658] sm:$0xff]  ;;  %v995_v33 = vpop.permute.xlu0 %994 }
 0x5f9   :  { %2446 = vmatprep.subr.bf16.mxu0 %v2445_v50  ;;  %2474 = vmatprep.subr.bf16.mxu1 %v2473_v51  ;;  %v1033_v3 = vsel %vm1025_vm10, %v928_v61, %v1014_v60  ;;  %v2461_v49 = vpack.c.bf16 %v1130_v41, %v1129_v40  ;;  %v2489_v50 = vpack.c.bf16 %v1160_v43, %v1159_v42  ;;  %v1114_v51 = vld [vmem:[%s3730_s1 + $0x488] sm:$0xff]  ;;  %v2584_v60 = vunpack.i.h.bf16 %v3359_v47  ;;  %v1173_v28 = vld [vmem:[%s3730_s1 + $0x660] sm:$0xff]  ;;  %v932_v40 = vpop.permute.xlu1 %931  ;;  %v1931_v13 = vld [vmem:[%s3730_s1 + $0x690] ss:$0 sm:$0xff] }
 0x5fa   :  { %1458 = vmatprep.mubr.f32.mxu1 %v1033_v3  ;;  %v2463_v57 = vpack.c.bf16 %v1114_v51, %v1113_v48  ;;  %v972_v61 = vrot.slane %v3322_v14, 4  ;;  %v2498_v3 = vpack.c.bf16 %v1164_v0, %v1163_v39  ;;  %v2510_v27 = vpack.c.bf16 %v1172_v25, %v1171_v23  ;;  %v1174_v29 = vld [vmem:[%s3730_s1 + $0x668] sm:$0xff]  ;;  %v1536_v44 = vld [vmem:[%s3730_s1 + $0x6a0] sm:$0xff]  ;;  %v1727_v25 = vld [vmem:[%s3730_s1 + $0x6d8] sm:$0xff] }
 0x5fb   :  { %v2513_v30 = vpack.c.bf16 %v1174_v29, %v1173_v28  ;;  %v997_v37 = vsel %vm12_vm3, %v3333_v26, %v995_v33  ;;  %v934_v42 = vsel %vm12_vm3, %v3311_v7, %v932_v40  ;;  %v1535_v26 = vld [vmem:[%s3730_s1 + $0x698] sm:$0xff]  ;;  %v1537_v7 = vld [vmem:[%s3730_s1 + $0x6a8] sm:$0xff] }
 0x5fc   :  { %2448 = vmatpush3.bf16.msra.mxu0 %v2447_v62  ;;  %2476 = vmatpush3.bf16.msra.mxu1 %v2475_v63  ;;  %v2493_v62 = vpack.c.bf16 %v1162_v54, %v1161_v53  ;;  %v1146_v63 = vld [vmem:[%s3730_s1 + $0x588] sm:$0xff]  ;;  %v990_v47 = vsel %vm12_vm3, %v972_v61, %v2589_v56  ;;  %v1015_v41 = vrot.slane %v997_v37, 7 }
 0x5fd   :  { %2450 = vmatprep.subr.bf16.mxu0 %v2449_v4  ;;  %2478 = vmatprep.subr.bf16.mxu1 %v2477_v5  ;;  %v2495_v14 = vpack.c.bf16 %v1146_v63, %v1145_v20  ;;  %v2594_v4 = vunpack.i.h.bf16 %v3405_v24  ;;  %v925_v5 = vsel %vm12_vm3, %v3234_v19, %v2584_v60  ;;  %v1013_v9 = vrot.slane %v990_v47, 7  ;;  %v1729_v29 = vld [vmem:[%s3730_s1 + $0x6e8] sm:$0xff] }
 0x5fe   :  { %v1030_v10 = vsel %vm1025_vm10, %v925_v5, %v1011_v2  ;;  %v909_v24 = vrot.slane %v3234_v19, 4  ;;  %v1034_v43 = vsel %vm1025_vm10, %v934_v42, %v1015_v41 }
 0x600   :  { %2452 = vmatpush3.bf16.msra.mxu0 %v2451_v15  ;;  %2480 = vmatpush3.bf16.msra.mxu1 %v2479_v16  ;;  %v927_v59 = vsel %vm12_vm3, %v909_v24, %v2594_v4  ;;  %v1167_v15 = vld [vmem:[%s3730_s1 + $0x630] sm:$0xff]  ;;  %v1168_v16 = vld [vmem:[%s3730_s1 + $0x638] sm:$0xff] }
 0x601   :  { %2454 = vmatprep.subr.bf16.mxu0 %v2453_v21  ;;  %2482 = vmatprep.subr.bf16.mxu1 %v2481_v22  ;;  %v1032_v19 = vsel %vm1025_vm10, %v927_v59, %v1013_v9  ;;  %v2504_v17 = vpack.c.bf16 %v1168_v16, %v1167_v15  ;;  %v1170_v21 = vld [vmem:[%s3730_s1 + $0x648] sm:$0xff]  ;;  %v1630_v59 = vld [vmem:[%s3730_s1 + $0x6b8] sm:$0xff]  ;;  %v1631_v15 = vld [vmem:[%s3730_s1 + $0x6c0] sm:$0xff] }
 0x602   :  { %v2507_v22 = vpack.c.bf16 %v1170_v21, %v1169_v18  ;;  %v1632_v16 = vld [vmem:[%s3730_s1 + $0x6c8] sm:$0xff] }
 0x604   :  { %2456 = vmatpush3.bf16.msra.mxu0 %v2455_v31  ;;  %2484 = vmatpush3.bf16.msra.mxu1 %v2483_v32  ;;  %v1175_v31 = vld [vmem:[%s3730_s1 + $0x670] sm:$0xff]  ;;  %v1176_v32 = vld [vmem:[%s3730_s1 + $0x678] sm:$0xff] }
 0x605   :  { %2458 = vmatprep.subr.bf16.mxu0 %v2457_v35  ;;  %2486 = vmatprep.subr.bf16.mxu1 %v2485_v36  ;;  %v2516_v34 = vpack.c.bf16 %v1176_v32, %v1175_v31  ;;  %v1177_v35 = vld [vmem:[%s3730_s1 + $0x680] sm:$0xff]  ;;  %v1178_v36 = vld [vmem:[%s3730_s1 + $0x688] sm:$0xff] }
 0x606   :  { %v2519_v38 = vpack.c.bf16 %v1178_v36, %v1177_v35 }
 0x608   :  { %2460 = vmatpush3.bf16.msra.mxu0 %v2459_v45  ;;  %2488 = vmatpush3.bf16.msra.mxu1 %v2487_v46  ;;  %v2522_v45 = vpack.c.bf16 %v1536_v44, %v1535_v26  ;;  %v1538_v46 = vld [vmem:[%s3730_s1 + $0x6b0] sm:$0xff]  ;;  %v1731_v26 = vld [vmem:[%s3730_s1 + $0x6f8] sm:$0xff]  ;;  %v1732_v44 = vld [vmem:[%s3730_s1 + $0x700] sm:$0xff] }
 0x609   :  { %2462 = vmatprep.subr.bf16.mxu0 %v2461_v49  ;;  %2490 = vmatprep.subr.bf16.mxu1 %v2489_v50  ;;  %v2525_v48 = vpack.c.bf16 %v1538_v46, %v1537_v7  ;;  %v2534_v7 = vpack.c.bf16 %v1732_v44, %v1731_v26  ;;  %v1734_v46 = vld [vmem:[%s3730_s1 + $0x710] sm:$0xff] }
 0x60c   :  { %2464 = vmatpush3.bf16.msra.mxu0 %v2463_v57  ;;  %2492 = vmatpush3.bf16.msra.mxu1 %v2491_v58 }
 0x60d   :  { %2494 = vmatprep.subr.bf16.mxu1 %v2493_v62  ;;  %2497 = vmatprep.subr.bf16.mxu0 %v2641_v1 }
 0x60f   :  { %1389 = vmatmul.mubr.f32.vlgmr.msra.gmra.mrb[20].mxu0 %v1030_v10 }
 0x610   :  { %2496 = vmatpush3.bf16.msra.mxu1 %v2495_v14  ;;  %2499 = vmatpush3.bf16.msra.mxu0 %v2498_v3 }
 0x611   :  { %2500 = vmatprep.subr.bf16.mxu0 %v2641_v1  ;;  %2220 = vmatprep.mubr.msk.f32.mxu0 %vm2642_vm11, %v2638_v11 }
 0x612   :  { %2521 = vmatprep.subr.bf16.mxu1 %v2641_v1 }
 0x613   :  { %1459 = vmatmul.mubr.f32.vlgmr.msra.gmra.mrb[20].mxu1 %v1032_v19  ;;  %v2528_v19 = vpack.c.bf16 %v1631_v15, %v1630_v59 }
 0x614   :  { %2502 = vmatpush3.bf16.msra.mxu0 %v2501_v12  ;;  %2231 = vmatprep.mubr.msk.f32.mxu1 %vm2642_vm11, %v2638_v11 }
 0x615   :  { %2503 = vmatprep.subr.bf16.mxu0 %v2641_v1  ;;  %2523 = vmatpush3.bf16.msra.mxu1 %v2522_v45  ;;  %v1733_v45 = vld [vmem:[%s3730_s1 + $0x708] sm:$0xff] }
 0x616   :  { %2524 = vmatprep.subr.bf16.mxu1 %v2641_v1 }
 0x618   :  { %2505 = vmatpush3.bf16.msra.mxu0 %v2504_v17  ;;  %v1633_v17 = vld [vmem:[%s3730_s1 + $0x6d0] sm:$0xff] }
 0x619   :  { %2506 = vmatprep.subr.bf16.mxu0 %v2641_v1  ;;  %2526 = vmatpush3.bf16.msra.mxu1 %v2525_v48  ;;  %v2531_v18 = vpack.c.bf16 %v1633_v17, %v1632_v16  ;;  %v2537_v48 = vpack.c.bf16 %v1734_v46, %v1733_v45 }
 0x61a   :  { %2527 = vmatprep.subr.bf16.mxu1 %v2641_v1 }
 0x61c   :  { %2508 = vmatpush3.bf16.msra.mxu0 %v2507_v22 }
 0x61d   :  { %2509 = vmatprep.subr.bf16.mxu0 %v2641_v1 }
 0x620   :  { %2511 = vmatpush3.bf16.msra.mxu0 %v2510_v27  ;;  %v1728_v27 = vld [vmem:[%s3730_s1 + $0x6e0] sm:$0xff] }
 0x621   :  { %2512 = vmatprep.subr.bf16.mxu0 %v2641_v1  ;;  %v2540_v28 = vpack.c.bf16 %v1728_v27, %v1727_v25 }
 0x624   :  { %2514 = vmatpush3.bf16.msra.mxu0 %v2513_v30  ;;  %v1730_v30 = vld [vmem:[%s3730_s1 + $0x6f0] sm:$0xff] }
 0x625   :  { %2515 = vmatprep.subr.bf16.mxu0 %v2641_v1  ;;  %v2543_v32 = vpack.c.bf16 %v1730_v30, %v1729_v29 }
 0x628   :  { %2517 = vmatpush3.bf16.msra.mxu0 %v2516_v34 }
 0x629   :  { %2518 = vmatprep.subr.bf16.mxu0 %v2641_v1 }
 0x62c   :  { %2520 = vmatpush3.bf16.msra.mxu0 %v2519_v38 }
 0x62d   :  { %2533 = vmatprep.subr.bf16.mxu0 %v2641_v1 }
 0x62f   :  { %2221 = vmatmul.mubr.f32.vlgmr.msra.gmra.mrb[22].mxu0 %v1034_v43 }
 0x630   :  { %2253 = vmatprep.mubr.msk.f32.mxu0 %vm2642_vm11, %v2638_v11  ;;  %2535 = vmatpush3.bf16.msra.mxu0 %v2534_v7 }
 0x631   :  { %2536 = vmatprep.subr.bf16.mxu0 %v2641_v1 }
 0x634   :  { %2538 = vmatpush3.bf16.msra.mxu0 %v2537_v48 }
 0x6c2   :  { %v1997_v49 = vpop.f32.mrb[18].mxu0 }
 0x6c3   :  { %v1998_v50 = vpop.f32.mrb[19].mxu0 }
 0x6c4   :  { %v1999_v51 = vadd.f32 %v1998_v50, %v1997_v49 }
 0x6c6   :  { %v2032_v52 = vpop.f32.mrb[18].mxu1  ;;  %v1251_v54 = vadd.f32 %v1999_v51, %v1931_v13 }
 0x6c7   :  { %v2033_v53 = vpop.f32.mrb[19].mxu1 }
 0x6c8   :  { %v2034_v55 = vadd.f32 %v2033_v53, %v2032_v52  ;;  %v1938_v53 = vld [vmem:[%s3730_s1 + $0x718] ss:$0 sm:$0xff] }
 0x6ca   :  { %v1321_v56 = vadd.f32 %v2034_v55, %v1251_v54 }
 0x6e2   :  { %v2067_v57 = vpop.f32.mrb[20].mxu0 }
 0x6e3   :  { %v2068_v58 = vpop.f32.mrb[21].mxu0 }
 0x6e4   :  { %v2069_v20 = vadd.f32 %v2068_v58, %v2067_v57 }
 0x6e6   :  { %v1391_v60 = vadd.f32 %v2069_v20, %v1321_v56  ;;  %v2102_v61 = vpop.f32.mrb[20].mxu1 }
 0x6e7   :  { %v2103_v62 = vpop.f32.mrb[21].mxu1 }
 0x6e8   :  { %v2104_v63 = vadd.f32 %v2103_v62, %v2102_v61 }
 0x6ea   :  { %v1461_v39 = vadd.f32 %v2104_v63, %v1391_v60 }
 0x702   :  { %v1530_v0 = vpop.f32.mrb[22].mxu0 }
 0x703   :  { %v1531_v2 = vadd.f32 %v1530_v0, %v1461_v39  ;;  %v2222_v47 = vpop.f32.mrb[23].mxu0 }
 0x705   :  { %v1534_v14 = vmax.f32 %v1531_v2, 0.0 }
 0x707   :  { %2232 = vmatmul.mubr.msk.f32.vlgmr.msra.gmra.mrb[22].mxu1 %vm231_vm7, %v1534_v14 }
 0x708   :  { %2242 = vmatprep.mubr.msk.f32.mxu1 %vm2642_vm11, %v2638_v11  ;;  %2529 = vmatpush3.bf16.msra.mxu1 %v2528_v19 }
 0x709   :  { %2530 = vmatprep.subr.bf16.mxu1 %v2641_v1 }
 0x70c   :  { %2532 = vmatpush3.bf16.msra.mxu1 %v2531_v18 }
 0x70d   :  { %2539 = vmatprep.subr.bf16.mxu1 %v2641_v1 }
 0x7da   :  { %v1608_v3 = vpop.f32.mrb[22].mxu1 }
 0x7db   :  { %2595 = vtanh.f32 %v1608_v3  ;;  %v2233_v4 = vpop.f32.mrb[23].mxu1  ;;  %v1933_v6 = vmul.f32 -1.442695, %v1608_v3 }
 0x7dd   :  { %2597 = vpow2.f32 %v1933_v6 }
 0x7e5   :  { %v2596_v5 = vpop.eup %2595 }
 0x7e6   :  { %1620 = vrot.lane.b32.xlu0 %v2596_v5, %s2643_s29 }
 0x7e7   :  { %v2598_v8 = vpop.eup %2597 }
 0x7e8   :  { %v1615_v9 = vadd.f32 1.0, %v2598_v8 }
 0x7ea   :  { %2599 = vrcp.f32 %v1615_v9 }
 0x7f4   :  { %v2600_v10 = vpop.eup %2599 }
 0x858   :  { %v1621_v24 = vpop.permute.xlu0 %1620 }
 0x859   :  { %v1623_v12 = vmul.f32 %v2600_v10, %v1621_v24 }
 0x85b   :  { %2601 = vtanh.f32 %v1623_v12 }
 0x865   :  { %v2602_v21 = vpop.eup %2601 }
 0x866   :  { %1626 = vrot.lane.b32.xlu1 %v2602_v21, %s2640_s21 }
 0x8d8   :  { %v1627_v22 = vpop.permute.xlu1 %1626 }
 0x8d9   :  { %v1629_v23 = vmul.f32 %v2600_v10, %v1627_v22 }
 0x8db   :  { %1635 = vrot.lane.b32.xlu0 %v1629_v23, %s2640_s21 }
 0x94d   :  { %v1636_v31 = vpop.permute.xlu0 %1635 }
 0x94e   :  { %2243 = vmatmul.mubr.msk.f32.vlgmr.msra.gmra.mrb[24].mxu1 %vm231_vm7, %v1636_v31 }
 0x94f   :  { %2541 = vmatpush3.bf16.msra.mxu1 %v2540_v28  ;;  %2264 = vmatprep.mubr.msk.f32.mxu1 %vm2642_vm11, %v2638_v11 }
 0x950   :  { %2542 = vmatprep.subr.bf16.mxu1 %v2641_v1 }
 0x953   :  { %2544 = vmatpush3.bf16.msra.mxu1 %v2543_v32 }
 0x956   :  { %2265 = vmatmul.mubr.msk.f32.vlgmr.msra.gmra.mrb[26].mxu1 %vm231_vm7, %v1636_v31 }
 0xa21   :  { %v1705_v33 = vpop.f32.mrb[24].mxu1 }
 0xa22   :  { %2603 = vtanh.f32 %v1705_v33  ;;  %v2244_v34 = vpop.f32.mrb[25].mxu1  ;;  %v1935_v38 = vmul.f32 -1.442695, %v1705_v33 }
 0xa24   :  { %2605 = vpow2.f32 %v1935_v38 }
 0xa29   :  { %v1876_v35 = vpop.f32.mrb[26].mxu1 }
 0xa2a   :  { %v2266_v36 = vpop.f32.mrb[27].mxu1 }
 0xa2c   :  { %v2604_v37 = vpop.eup %2603 }
 0xa2d   :  { %1717 = vrot.lane.b32.xlu1 %v2604_v37, %s2643_s29  ;;  %s1894_s29 = sshll.u32 %s2644_s28, 4  ;;  %s1895_s29 = int_to_ptr.vmem [resolvable:$true] %s1894_s29 }
 0xa2e   :  { %v2606_v40 = vpop.eup %2605  ;;  %s2611_s30 = scalar_lea.vmem %s1895_s29, 32  ;;  %p2616_p1 = scmp.lt.s32.totalorder %s1895_s29, %s1895_s29 }
 0xa2f   :  { %v1712_v41 = vadd.f32 1.0, %v2606_v40  ;;  %p2612_p0 = scmp.ne.s32.totalorder %s1895_s29, %s2611_s30  ;;  %p2617_p2 = scmp.lt.s32.totalorder %s2611_s30, %s2611_s30 }
 0xa31   :  { %2607 = vrcp.f32 %v1712_v41  ;;  %p2618_p3 = por %p2617_p2, %p2616_p1 }
 0xa33   :  { %p2619_p4 = pnand %p2618_p3, %p2612_p0 }
 0xa3b   :  { %v2608_v42 = vpop.eup %2607 }
 0xa9f   :  { %v1718_v11 = vpop.permute.xlu1 %1717 }
 0xaa0   :  { %v1720_v43 = vmul.f32 %v2608_v42, %v1718_v11 }
 0xaa2   :  { %2609 = vtanh.f32 %v1720_v43 }
 0xaac   :  { %v2610_v49 = vpop.eup %2609 }
 0xaad   :  { %1723 = vrot.lane.b32.xlu0 %v2610_v49, %s2640_s21 }
 0xb1f   :  { %v1724_v50 = vpop.permute.xlu0 %1723 }
 0xb20   :  { %v1726_v51 = vmul.f32 %v2608_v42, %v1724_v50 }
 0xb22   :  { %1736 = vrot.lane.b32.xlu1 %v1726_v51, %s2640_s21 }
 0xb94   :  { %v1737_v13 = vpop.permute.xlu1 %1736 }
 0xb95   :  { %2254 = vmatmul.mubr.msk.f32.vlgmr.msra.gmra.mrb[24].mxu0 %vm231_vm7, %v1737_v13 }
 0xc68   :  { %v1806_v52 = vpop.f32.mrb[24].mxu0 }
 0xc69   :  { %v1877_v54 = vadd.f32 %v1876_v35, %v1806_v52  ;;  %v2255_v1 = vpop.f32.mrb[25].mxu0 }
 0xc6b   :  { %v1885_v55 = vadd.f32 %v1938_v53, %v1877_v54 }
 0xc6d   :  { %1887 = vst.msk [vmem:[#allocation3] sm:$0x3] %vm1886_vm12, %v1885_v55 }
 0xc6e   :  { %2622 = shalt.err (!%p2619_p4)
}
 0xc6f   :  { %s2623_s4 = scalar_lea.hbm %s3731_s2, 32 }
 0xc70   :  { %p2624_p5 = scmp.ne.s32.totalorder %s3731_s2, %s2623_s4  ;;  %p2627_p6 = scmp.lt.u32.totalorder %s2623_s4, %s3731_s2 }
 0xc72   :  { %p2629_p7 = pnand %p2627_p6, %p2624_p5 }
 0xc74   :  { %2632 = shalt.err (!%p2629_p7)
}
 0xc75   :  { %1897 = dma.vmem_to_hbm [thread:$0]  %s1895_s29, 32, %s3731_s2, [#allocation4]  }
 0xc76   :  { %2633 = dma.done.wait [#allocation4], 32  }
 0xc77   :  { %2634 = vsyncadd [#allocation4], 4294967264 }
 0xc78   :  { %1901 = vsyncpa [#allocation4], 1 }

</bundles_post_ra>
